<compile_context>
chip_gen: v7x
topology: tpu7x:2x2x1
jax: 0.10.0
libtpu: 0.0.40
codegen_flags: <defaults>
</compile_context>

<pallas_src>
import functools

import jax
import jax.numpy as jnp
from jax.experimental import pallas as pl


# ------------------------------ fused kernel --------------------------------

def _layer_norm(z, g, b, eps):
    mu = jnp.mean(z, axis=-1, keepdims=True)
    var = jnp.mean((z - mu) ** 2, axis=-1, keepdims=True)
    return (z - mu) * jax.lax.rsqrt(var + eps) * g + b


def _encoder_kernel(*refs, num_layers, n_head, batch, seq, d_model, d_ff, eps,
                    apply_final_norm):
    if apply_final_norm:
        (x_ref, wqkv_ref, wo_ref, w1_ref, w2_ref, vecs_ref, fnorm_ref,
         x_out_ref, series_ref, atte_ref) = refs
    else:
        (x_ref, wqkv_ref, wo_ref, w1_ref, w2_ref, vecs_ref,
         x_out_ref, series_ref, atte_ref) = refs
        fnorm_ref = None

    B, S, H, D, F = batch, seq, n_head, d_model, d_ff
    dh = D // H
    scale = 1.0 / (dh ** 0.5)
    inv_h = 1.0 / H
    rows = B * S

    x = x_ref[...]                                      # (B*S, D), batch-major rows

    for l in range(num_layers):                         # static unroll (L small)
        r0 = 8 * l                                      # packed bias/LN slab rows for layer l
        bqkv = vecs_ref[r0 + 0:r0 + 1, 0:3 * D]         # (1, 3D)
        bo   = vecs_ref[r0 + 1:r0 + 2, 0:D]
        b1   = vecs_ref[r0 + 2:r0 + 3, 0:F]
        b2   = vecs_ref[r0 + 3:r0 + 4, 0:D]
        ln1g = vecs_ref[r0 + 4:r0 + 5, 0:D]
        ln1b = vecs_ref[r0 + 5:r0 + 6, 0:D]
        ln2g = vecs_ref[r0 + 6:r0 + 7, 0:D]
        ln2b = vecs_ref[r0 + 7:r0 + 8, 0:D]

        # Fused QKV projection: one (B*S, D) @ (D, 3D) MXU pass per layer.
        qkv = jnp.dot(x, wqkv_ref[l], preferred_element_type=jnp.float32) + bqkv

        # Split heads (static lane slices + sublane-split reshapes), then batch ALL heads
        # into single rank-3 einsums with a leading (b, h) batch dim.
        def head_views(col0):
            return [qkv[:, col0 + h * dh: col0 + (h + 1) * dh].reshape(B, S, dh)
                    for h in range(H)]

        q = jnp.stack(head_views(0 * D), axis=1).reshape(B * H, S, dh)
        k = jnp.stack(head_views(1 * D), axis=1).reshape(B * H, S, dh)
        v = jnp.stack(head_views(2 * D), axis=1).reshape(B * H, S, dh)

        s = jnp.einsum('nqd,nkd->nqk', q, k,
                       preferred_element_type=jnp.float32) * scale
        s = s - jnp.max(s, axis=-1, keepdims=True)
        p = jnp.exp(s)
        p = p / jnp.sum(p, axis=-1, keepdims=True)       # exact softmax (maps are model outputs)

        # Attention maps, already in final (b, h, q, k) order -> no wrapper transpose needed.
        series_ref[l] = p                                # (B*H, S, S)
        atte_ref[l] = jnp.sum(p.reshape(B, H, S, S), axis=1) * inv_h   # head-averaged (B, S, S)

        # Attention output stays in registers; heads re-merged with a lane concat
        # (no VMEM scratch round trip).
        o = jnp.einsum('nqk,nkd->nqd', p, v,
                       preferred_element_type=jnp.float32).reshape(B, H, S, dh)
        o2d = jnp.concatenate([o[:, h].reshape(rows, dh) for h in range(H)], axis=1)

        attn = jnp.dot(o2d, wo_ref[l], preferred_element_type=jnp.float32) + bo
        x1 = _layer_norm(x + attn, ln1g, ln1b, eps)

        ff = jnp.maximum(
            jnp.dot(x1, w1_ref[l], preferred_element_type=jnp.float32) + b1, 0.0)
        ff = jnp.dot(ff, w2_ref[l], preferred_element_type=jnp.float32) + b2
        x = _layer_norm(x1 + ff, ln2g, ln2b, eps)

    if apply_final_norm:
        x = _layer_norm(x, fnorm_ref[0:1, :], fnorm_ref[1:2, :], eps)

    x_out_ref[...] = x


# --------------------------- parameters / glue ------------------------------

def _xavier(key, fan_in, fan_out):
    limit = (6.0 / (fan_in + fan_out)) ** 0.5
    return jax.random.uniform(key, (fan_in, fan_out), jnp.float32, -limit, limit)


def init_stacked_params(key, num_layers, d_model, n_head, d_ff):
    """Stacked per-layer weights + one packed slab for all bias / LayerNorm vectors."""
    D, F, L = d_model, d_ff, num_layers
    VW = max(3 * D, F, D)

    wqkv, wo, w1, w2 = [], [], [], []
    for l in range(L):
        kl = jax.random.fold_in(key, l)
        k0, k1, k2, k3, k4, k5 = jax.random.split(kl, 6)
        wq = _xavier(k0, D, D)
        wk = _xavier(k1, D, D)
        wv = _xavier(k2, D, D)
        wqkv.append(jnp.concatenate([wq, wk, wv], axis=1))    # fused (D, 3D)
        wo.append(_xavier(k3, D, D))
        w1.append(_xavier(k4, D, F))
        w2.append(_xavier(k5, F, D))

    def row(v):
        return jnp.pad(v, (0, VW - v.shape[0]))[None, :]

    vec_rows = []
    for _ in range(L):
        vec_rows += [
            row(jnp.zeros((3 * D,), jnp.float32)),   # bqkv
            row(jnp.zeros((D,), jnp.float32)),       # bo
            row(jnp.zeros((F,), jnp.float32)),       # b1
            row(jnp.zeros((D,), jnp.float32)),       # b2
            row(jnp.ones((D,), jnp.float32)),        # ln1 gamma
            row(jnp.zeros((D,), jnp.float32)),       # ln1 beta
            row(jnp.ones((D,), jnp.float32)),        # ln2 gamma
            row(jnp.zeros((D,), jnp.float32)),       # ln2 beta
        ]
    vecs = jnp.concatenate(vec_rows, axis=0)         # (8L, VW): ONE DMA at run time

    return {"wqkv": jnp.stack(wqkv), "wo": jnp.stack(wo),
            "w1": jnp.stack(w1), "w2": jnp.stack(w2), "vecs": vecs}


@functools.partial(jax.jit, static_argnames=("n_head",))
def transformer_encoder_forward(src, params, n_head, norm_params=None, eps=1e-5):
    S, B, D = src.shape
    L = params["wqkv"].shape[0]
    F = params["w1"].shape[-1]
    H = n_head

    # Single entry transpose to batch-major (B*S, D); everything else lives in the kernel.
    x2d = jnp.transpose(src, (1, 0, 2)).reshape(B * S, D)

    apply_final_norm = norm_params is not None
    operands = [x2d, params["wqkv"], params["wo"], params["w1"], params["w2"],
                params["vecs"]]
    if apply_final_norm:
        fnorm = jnp.stack([norm_params["g"].reshape(-1),
                           norm_params["b"].reshape(-1)], axis=0)      # (2, D)
        operands.append(fnorm)

    kernel = functools.partial(
        _encoder_kernel, num_layers=L, n_head=H, batch=B, seq=S,
        d_model=D, d_ff=F, eps=eps, apply_final_norm=apply_final_norm)

    out2d, series_flat, atte_all = pl.pallas_call(
        kernel,
        out_shape=(
            jax.ShapeDtypeStruct((B * S, D), jnp.float32),       # encoder output
            jax.ShapeDtypeStruct((L, B * H, S, S), jnp.float32),  # per-head attention (b,h) order
            jax.ShapeDtypeStruct((L, B, S, S), jnp.float32),      # head-averaged attention
        ),
    )(*operands)

    x = out2d.reshape(B, S, D).transpose(1, 0, 2)                 # back to (S, B, D)
    series_all = series_flat.reshape(L, B, H, S, S)               # free reshape, final order

    atte_s = [atte_all[l] for l in range(L)]
    adj_s = list(atte_s)                       # adj is an alias of atte in this encoder layer
    series_s = [series_all[l] for l in range(L)]

    # Gaussian-distance prior (sigma=1.0), row-normalized; input-independent -> constant-folded.
    idx = jnp.arange(S, dtype=jnp.float32)
    dist = idx[:, None] - idx[None, :]
    g = jnp.exp(-0.5 * dist * dist)
    g = g / jnp.sum(g, axis=-1, keepdims=True)
    prior = jnp.broadcast_to(g, (B, H, S, S))
    prior_s = [prior for _ in range(L)]

    return x, atte_s, adj_s, series_s, prior_s


# ---------------------------------- main -------------------------------------

if __name__ == "__main__":
    # Small shapes consistent with the module: d_model=32, batch_size=2, input_window=8
    S, B, D = 8, 2, 32          # (input_window, batch_size, d_model)
    N_HEAD, D_FF = 4, 64
    NUM_LAYERS = 2

    key = jax.random.PRNGKey(0)
    k_src, k_par = jax.random.split(key)

    src = jax.random.normal(k_src, (S, B, D), jnp.float32)
    params = init_stacked_params(k_par, NUM_LAYERS, D, N_HEAD, D_FF)
    norm_params = {"g": jnp.ones((D,), jnp.float32), "b": jnp.zeros((D,), jnp.float32)}

    x, atte_s, adj_s, series_s, prior_s = transformer_encoder_forward(
        src, params, N_HEAD, norm_params=norm_params
    )

    jax.block_until_ready(x)
    for t in atte_s + adj_s + series_s + prior_s:
        jax.block_until_ready(t)

    assert x.shape == (S, B, D)
    assert atte_s[0].shape == (B, S, S)
    assert adj_s[0].shape == (B, S, S)
    assert series_s[0].shape == (B, N_HEAD, S, S)
    assert prior_s[0].shape == (B, N_HEAD, S, S)
    print("KERNEL_OK")
</pallas_src>

<mosaic_0001>
module attributes {stable_mosaic.version = 11 : i64} {
  func.func @_encoder_kernel(%arg0: memref<16x32xf32, #tpu.memory_space<vmem>>, %arg1: memref<2x32x96xf32, #tpu.memory_space<vmem>>, %arg2: memref<2x32x32xf32, #tpu.memory_space<vmem>>, %arg3: memref<2x32x64xf32, #tpu.memory_space<vmem>>, %arg4: memref<2x64x32xf32, #tpu.memory_space<vmem>>, %arg5: memref<16x96xf32, #tpu.memory_space<vmem>>, %arg6: memref<2x32xf32, #tpu.memory_space<vmem>>, %arg7: memref<16x32xf32, #tpu.memory_space<vmem>>, %arg8: memref<2x8x8x8xf32, #tpu.memory_space<vmem>>, %arg9: memref<2x2x8x8xf32, #tpu.memory_space<vmem>>) attributes {dimension_semantics = [], scalar_prefetch = 0 : i64, scratch_operands = 0 : i64, tpu.core_type = #tpu.core_type<tc>} {
    %c0 = arith.constant 0 : index
    %c0_0 = arith.constant 0 : index
    %0 = vector.load %arg0[%c0, %c0_0] : memref<16x32xf32, #tpu.memory_space<vmem>>, vector<16x32xf32>
    %c0_1 = arith.constant 0 : index
    %c0_2 = arith.constant 0 : index
    %1 = vector.load %arg5[%c0_1, %c0_2] : memref<16x96xf32, #tpu.memory_space<vmem>>, vector<1x96xf32>
    %c1 = arith.constant 1 : index
    %c0_3 = arith.constant 0 : index
    %2 = vector.load %arg5[%c1, %c0_3] : memref<16x96xf32, #tpu.memory_space<vmem>>, vector<1x32xf32>
    %c2 = arith.constant 2 : index
    %c0_4 = arith.constant 0 : index
    %3 = vector.load %arg5[%c2, %c0_4] : memref<16x96xf32, #tpu.memory_space<vmem>>, vector<1x64xf32>
    %c3 = arith.constant 3 : index
    %c0_5 = arith.constant 0 : index
    %4 = vector.load %arg5[%c3, %c0_5] : memref<16x96xf32, #tpu.memory_space<vmem>>, vector<1x32xf32>
    %c4 = arith.constant 4 : index
    %c0_6 = arith.constant 0 : index
    %5 = vector.load %arg5[%c4, %c0_6] : memref<16x96xf32, #tpu.memory_space<vmem>>, vector<1x32xf32>
    %c5 = arith.constant 5 : index
    %c0_7 = arith.constant 0 : index
    %6 = vector.load %arg5[%c5, %c0_7] : memref<16x96xf32, #tpu.memory_space<vmem>>, vector<1x32xf32>
    %c6 = arith.constant 6 : index
    %c0_8 = arith.constant 0 : index
    %7 = vector.load %arg5[%c6, %c0_8] : memref<16x96xf32, #tpu.memory_space<vmem>>, vector<1x32xf32>
    %c7 = arith.constant 7 : index
    %c0_9 = arith.constant 0 : index
    %8 = vector.load %arg5[%c7, %c0_9] : memref<16x96xf32, #tpu.memory_space<vmem>>, vector<1x32xf32>
    %c0_10 = arith.constant 0 : index
    %c0_11 = arith.constant 0 : index
    %c0_12 = arith.constant 0 : index
    %9 = vector.load %arg1[%c0_10, %c0_11, %c0_12] : memref<2x32x96xf32, #tpu.memory_space<vmem>>, vector<1x32x96xf32>
    %10 = vector.shape_cast %9 : vector<1x32x96xf32> to vector<32x96xf32>
    %cst = arith.constant dense<0.000000e+00> : vector<16x96xf32>
    %11 = tpu.matmul %0, %10, %cst {dimension_numbers = #tpu.dot_dimension_numbers<[1], [0], [0], [1], [0, 0, 1, 1], [], []>} : vector<16x32xf32>, vector<32x96xf32>, vector<16x96xf32> -> vector<16x96xf32>
    %12 = vector.broadcast %1 : vector<1x96xf32> to vector<16x96xf32>
    %13 = arith.addf %11, %12 : vector<16x96xf32>
    %14 = vector.extract_strided_slice %13 {offsets = [0, 0], sizes = [16, 8], strides = [1, 1]} : vector<16x96xf32> to vector<16x8xf32>
    %15 = vector.shape_cast %14 : vector<16x8xf32> to vector<2x8x8xf32>
    %16 = vector.extract_strided_slice %13 {offsets = [0, 8], sizes = [16, 8], strides = [1, 1]} : vector<16x96xf32> to vector<16x8xf32>
    %17 = vector.shape_cast %16 : vector<16x8xf32> to vector<2x8x8xf32>
    %18 = vector.extract_strided_slice %13 {offsets = [0, 16], sizes = [16, 8], strides = [1, 1]} : vector<16x96xf32> to vector<16x8xf32>
    %19 = vector.shape_cast %18 : vector<16x8xf32> to vector<2x8x8xf32>
    %20 = vector.extract_strided_slice %13 {offsets = [0, 24], sizes = [16, 8], strides = [1, 1]} : vector<16x96xf32> to vector<16x8xf32>
    %21 = vector.shape_cast %20 : vector<16x8xf32> to vector<2x8x8xf32>
    %22 = vector.shape_cast %15 : vector<2x8x8xf32> to vector<2x1x8x8xf32>
    %23 = vector.shape_cast %17 : vector<2x8x8xf32> to vector<2x1x8x8xf32>
    %24 = vector.shape_cast %19 : vector<2x8x8xf32> to vector<2x1x8x8xf32>
    %25 = vector.shape_cast %21 : vector<2x8x8xf32> to vector<2x1x8x8xf32>
    %26 = tpu.concatenate %22, %23, %24, %25 in 1 : vector<2x1x8x8xf32>, vector<2x1x8x8xf32>, vector<2x1x8x8xf32>, vector<2x1x8x8xf32> -> vector<2x4x8x8xf32>
    %27 = vector.shape_cast %26 : vector<2x4x8x8xf32> to vector<8x8x8xf32>
    %28 = vector.extract_strided_slice %13 {offsets = [0, 32], sizes = [16, 8], strides = [1, 1]} : vector<16x96xf32> to vector<16x8xf32>
    %29 = vector.shape_cast %28 : vector<16x8xf32> to vector<2x8x8xf32>
    %30 = vector.extract_strided_slice %13 {offsets = [0, 40], sizes = [16, 8], strides = [1, 1]} : vector<16x96xf32> to vector<16x8xf32>
    %31 = vector.shape_cast %30 : vector<16x8xf32> to vector<2x8x8xf32>
    %32 = vector.extract_strided_slice %13 {offsets = [0, 48], sizes = [16, 8], strides = [1, 1]} : vector<16x96xf32> to vector<16x8xf32>
    %33 = vector.shape_cast %32 : vector<16x8xf32> to vector<2x8x8xf32>
    %34 = vector.extract_strided_slice %13 {offsets = [0, 56], sizes = [16, 8], strides = [1, 1]} : vector<16x96xf32> to vector<16x8xf32>
    %35 = vector.shape_cast %34 : vector<16x8xf32> to vector<2x8x8xf32>
    %36 = vector.shape_cast %29 : vector<2x8x8xf32> to vector<2x1x8x8xf32>
    %37 = vector.shape_cast %31 : vector<2x8x8xf32> to vector<2x1x8x8xf32>
    %38 = vector.shape_cast %33 : vector<2x8x8xf32> to vector<2x1x8x8xf32>
    %39 = vector.shape_cast %35 : vector<2x8x8xf32> to vector<2x1x8x8xf32>
    %40 = tpu.concatenate %36, %37, %38, %39 in 1 : vector<2x1x8x8xf32>, vector<2x1x8x8xf32>, vector<2x1x8x8xf32>, vector<2x1x8x8xf32> -> vector<2x4x8x8xf32>
    %41 = vector.shape_cast %40 : vector<2x4x8x8xf32> to vector<8x8x8xf32>
    %42 = vector.extract_strided_slice %13 {offsets = [0, 64], sizes = [16, 8], strides = [1, 1]} : vector<16x96xf32> to vector<16x8xf32>
    %43 = vector.shape_cast %42 : vector<16x8xf32> to vector<2x8x8xf32>
    %44 = vector.extract_strided_slice %13 {offsets = [0, 72], sizes = [16, 8], strides = [1, 1]} : vector<16x96xf32> to vector<16x8xf32>
    %45 = vector.shape_cast %44 : vector<16x8xf32> to vector<2x8x8xf32>
    %46 = vector.extract_strided_slice %13 {offsets = [0, 80], sizes = [16, 8], strides = [1, 1]} : vector<16x96xf32> to vector<16x8xf32>
    %47 = vector.shape_cast %46 : vector<16x8xf32> to vector<2x8x8xf32>
    %48 = vector.extract_strided_slice %13 {offsets = [0, 88], sizes = [16, 8], strides = [1, 1]} : vector<16x96xf32> to vector<16x8xf32>
    %49 = vector.shape_cast %48 : vector<16x8xf32> to vector<2x8x8xf32>
    %50 = vector.shape_cast %43 : vector<2x8x8xf32> to vector<2x1x8x8xf32>
    %51 = vector.shape_cast %45 : vector<2x8x8xf32> to vector<2x1x8x8xf32>
    %52 = vector.shape_cast %47 : vector<2x8x8xf32> to vector<2x1x8x8xf32>
    %53 = vector.shape_cast %49 : vector<2x8x8xf32> to vector<2x1x8x8xf32>
    %54 = tpu.concatenate %50, %51, %52, %53 in 1 : vector<2x1x8x8xf32>, vector<2x1x8x8xf32>, vector<2x1x8x8xf32>, vector<2x1x8x8xf32> -> vector<2x4x8x8xf32>
    %55 = vector.shape_cast %54 : vector<2x4x8x8xf32> to vector<8x8x8xf32>
    "tpu.trace_start"() <{level = 10 : i32, message = "nqd,nkd->nqk"}> : () -> ()
    %cst_13 = arith.constant dense<0.000000e+00> : vector<8x8x8xf32>
    %56 = tpu.matmul %27, %41, %cst_13 {dimension_numbers = #tpu.dot_dimension_numbers<[2], [2], [1], [1], [0, 0, 0, 1, 1, 1], [0], [0]>} : vector<8x8x8xf32>, vector<8x8x8xf32>, vector<8x8x8xf32> -> vector<8x8x8xf32>
    "tpu.trace_stop"() : () -> ()
    %cst_14 = arith.constant 0.353553385 : f32
    %57 = vector.broadcast %cst_14 : f32 to vector<8x8x8xf32>
    %58 = arith.mulf %56, %57 : vector<8x8x8xf32>
    %cst_15 = arith.constant dense<0xFF800000> : vector<8x8xf32>
    %59 = vector.multi_reduction <maximumf>, %58, %cst_15 [2] : vector<8x8x8xf32> to vector<8x8xf32>
    %60 = vector.shape_cast %59 : vector<8x8xf32> to vector<8x8x1xf32>
    %61 = vector.broadcast %60 : vector<8x8x1xf32> to vector<8x8x8xf32>
    %62 = arith.subf %58, %61 : vector<8x8x8xf32>
    %63 = math.exp %62 : vector<8x8x8xf32>
    %cst_16 = arith.constant dense<0.000000e+00> : vector<8x8xf32>
    %64 = vector.multi_reduction <add>, %63, %cst_16 [2] : vector<8x8x8xf32> to vector<8x8xf32>
    %65 = vector.shape_cast %64 : vector<8x8xf32> to vector<8x8x1xf32>
    %66 = vector.broadcast %65 : vector<8x8x1xf32> to vector<8x8x8xf32>
    %67 = arith.divf %63, %66 : vector<8x8x8xf32>
    %c0_17 = arith.constant 0 : index
    %c0_18 = arith.constant 0 : index
    %c0_19 = arith.constant 0 : index
    %c0_20 = arith.constant 0 : index
    %68 = vector.load %arg8[%c0_17, %c0_18, %c0_19, %c0_20] : memref<2x8x8x8xf32, #tpu.memory_space<vmem>>, vector<1x8x8x8xf32>
    %69 = vector.shape_cast %68 : vector<1x8x8x8xf32> to vector<8x8x8xf32>
    %70 = vector.shape_cast %67 : vector<8x8x8xf32> to vector<1x8x8x8xf32>
    tpu.vector_store %arg8[%c0_17, %c0_18, %c0_19, %c0_20], %70 {strides = array<i32>} : memref<2x8x8x8xf32, #tpu.memory_space<vmem>>, vector<1x8x8x8xf32>,
    %71 = vector.shape_cast %67 : vector<8x8x8xf32> to vector<2x4x8x8xf32>
    %cst_21 = arith.constant dense<0.000000e+00> : vector<2x8x8xf32>
    %72 = vector.multi_reduction <add>, %71, %cst_21 [1] : vector<2x4x8x8xf32> to vector<2x8x8xf32>
    %cst_22 = arith.constant 2.500000e-01 : f32
    %73 = vector.broadcast %cst_22 : f32 to vector<2x8x8xf32>
    %74 = arith.mulf %72, %73 : vector<2x8x8xf32>
    %c0_23 = arith.constant 0 : index
    %c0_24 = arith.constant 0 : index
    %c0_25 = arith.constant 0 : index
    %c0_26 = arith.constant 0 : index
    %75 = vector.load %arg9[%c0_23, %c0_24, %c0_25, %c0_26] : memref<2x2x8x8xf32, #tpu.memory_space<vmem>>, vector<1x2x8x8xf32>
    %76 = vector.shape_cast %75 : vector<1x2x8x8xf32> to vector<2x8x8xf32>
    %77 = vector.shape_cast %74 : vector<2x8x8xf32> to vector<1x2x8x8xf32>
    tpu.vector_store %arg9[%c0_23, %c0_24, %c0_25, %c0_26], %77 {strides = array<i32>} : memref<2x2x8x8xf32, #tpu.memory_space<vmem>>, vector<1x2x8x8xf32>,
    "tpu.trace_start"() <{level = 10 : i32, message = "nqk,nkd->nqd"}> : () -> ()
    %cst_27 = arith.constant dense<0.000000e+00> : vector<8x8x8xf32>
    %78 = tpu.matmul %67, %55, %cst_27 {dimension_numbers = #tpu.dot_dimension_numbers<[2], [1], [1], [2], [0, 0, 0, 1, 1, 2], [0], [0]>} : vector<8x8x8xf32>, vector<8x8x8xf32>, vector<8x8x8xf32> -> vector<8x8x8xf32>
    "tpu.trace_stop"() : () -> ()
    %79 = vector.shape_cast %78 : vector<8x8x8xf32> to vector<2x4x8x8xf32>
    %80 = vector.extract_strided_slice %79 {offsets = [0, 0, 0, 0], sizes = [2, 1, 8, 8], strides = [1, 1, 1, 1]} : vector<2x4x8x8xf32> to vector<2x1x8x8xf32>
    %81 = vector.shape_cast %80 : vector<2x1x8x8xf32> to vector<2x8x8xf32>
    %82 = vector.shape_cast %81 : vector<2x8x8xf32> to vector<16x8xf32>
    %83 = vector.extract_strided_slice %79 {offsets = [0, 1, 0, 0], sizes = [2, 1, 8, 8], strides = [1, 1, 1, 1]} : vector<2x4x8x8xf32> to vector<2x1x8x8xf32>
    %84 = vector.shape_cast %83 : vector<2x1x8x8xf32> to vector<2x8x8xf32>
    %85 = vector.shape_cast %84 : vector<2x8x8xf32> to vector<16x8xf32>
    %86 = vector.extract_strided_slice %79 {offsets = [0, 2, 0, 0], sizes = [2, 1, 8, 8], strides = [1, 1, 1, 1]} : vector<2x4x8x8xf32> to vector<2x1x8x8xf32>
    %87 = vector.shape_cast %86 : vector<2x1x8x8xf32> to vector<2x8x8xf32>
    %88 = vector.shape_cast %87 : vector<2x8x8xf32> to vector<16x8xf32>
    %89 = vector.extract_strided_slice %79 {offsets = [0, 3, 0, 0], sizes = [2, 1, 8, 8], strides = [1, 1, 1, 1]} : vector<2x4x8x8xf32> to vector<2x1x8x8xf32>
    %90 = vector.shape_cast %89 : vector<2x1x8x8xf32> to vector<2x8x8xf32>
    %91 = vector.shape_cast %90 : vector<2x8x8xf32> to vector<16x8xf32>
    %92 = tpu.concatenate %82, %85, %88, %91 in 1 : vector<16x8xf32>, vector<16x8xf32>, vector<16x8xf32>, vector<16x8xf32> -> vector<16x32xf32>
    %c0_28 = arith.constant 0 : index
    %c0_29 = arith.constant 0 : index
    %c0_30 = arith.constant 0 : index
    %93 = vector.load %arg2[%c0_28, %c0_29, %c0_30] : memref<2x32x32xf32, #tpu.memory_space<vmem>>, vector<1x32x32xf32>
    %94 = vector.shape_cast %93 : vector<1x32x32xf32> to vector<32x32xf32>
    %cst_31 = arith.constant dense<0.000000e+00> : vector<16x32xf32>
    %95 = tpu.matmul %92, %94, %cst_31 {dimension_numbers = #tpu.dot_dimension_numbers<[1], [0], [0], [1], [0, 0, 1, 1], [], []>} : vector<16x32xf32>, vector<32x32xf32>, vector<16x32xf32> -> vector<16x32xf32>
    %96 = vector.broadcast %2 : vector<1x32xf32> to vector<16x32xf32>
    %97 = arith.addf %95, %96 : vector<16x32xf32>
    %98 = arith.addf %0, %97 : vector<16x32xf32>
    %cst_32 = arith.constant dense<0.000000e+00> : vector<16xf32>
    %99 = vector.multi_reduction <add>, %98, %cst_32 [1] : vector<16x32xf32> to vector<16xf32>
    %100 = vector.shape_cast %99 : vector<16xf32> to vector<16x1xf32>
    %cst_33 = arith.constant 3.200000e+01 : f32
    %101 = vector.broadcast %cst_33 : f32 to vector<16x1xf32>
    %102 = arith.divf %100, %101 : vector<16x1xf32>
    %103 = vector.broadcast %102 : vector<16x1xf32> to vector<16x32xf32>
    %104 = arith.subf %98, %103 : vector<16x32xf32>
    %105 = arith.mulf %104, %104 : vector<16x32xf32>
    %cst_34 = arith.constant dense<0.000000e+00> : vector<16xf32>
    %106 = vector.multi_reduction <add>, %105, %cst_34 [1] : vector<16x32xf32> to vector<16xf32>
    %107 = vector.shape_cast %106 : vector<16xf32> to vector<16x1xf32>
    %cst_35 = arith.constant 3.200000e+01 : f32
    %108 = vector.broadcast %cst_35 : f32 to vector<16x1xf32>
    %109 = arith.divf %107, %108 : vector<16x1xf32>
    %110 = vector.broadcast %102 : vector<16x1xf32> to vector<16x32xf32>
    %111 = arith.subf %98, %110 : vector<16x32xf32>
    %cst_36 = arith.constant 9.99999974E-6 : f32
    %112 = vector.broadcast %cst_36 : f32 to vector<16x1xf32>
    %113 = arith.addf %109, %112 : vector<16x1xf32>
    %114 = math.rsqrt %113 : vector<16x1xf32>
    %115 = vector.broadcast %114 : vector<16x1xf32> to vector<16x32xf32>
    %116 = arith.mulf %111, %115 : vector<16x32xf32>
    %117 = vector.broadcast %5 : vector<1x32xf32> to vector<16x32xf32>
    %118 = arith.mulf %116, %117 : vector<16x32xf32>
    %119 = vector.broadcast %6 : vector<1x32xf32> to vector<16x32xf32>
    %120 = arith.addf %118, %119 : vector<16x32xf32>
    %c0_37 = arith.constant 0 : index
    %c0_38 = arith.constant 0 : index
    %c0_39 = arith.constant 0 : index
    %121 = vector.load %arg3[%c0_37, %c0_38, %c0_39] : memref<2x32x64xf32, #tpu.memory_space<vmem>>, vector<1x32x64xf32>
    %122 = vector.shape_cast %121 : vector<1x32x64xf32> to vector<32x64xf32>
    %cst_40 = arith.constant dense<0.000000e+00> : vector<16x64xf32>
    %123 = tpu.matmul %120, %122, %cst_40 {dimension_numbers = #tpu.dot_dimension_numbers<[1], [0], [0], [1], [0, 0, 1, 1], [], []>} : vector<16x32xf32>, vector<32x64xf32>, vector<16x64xf32> -> vector<16x64xf32>
    %124 = vector.broadcast %3 : vector<1x64xf32> to vector<16x64xf32>
    %125 = arith.addf %123, %124 : vector<16x64xf32>
    %cst_41 = arith.constant 0.000000e+00 : f32
    %126 = vector.broadcast %cst_41 : f32 to vector<16x64xf32>
    %127 = arith.maximumf %125, %126 : vector<16x64xf32>
    %c0_42 = arith.constant 0 : index
    %c0_43 = arith.constant 0 : index
    %c0_44 = arith.constant 0 : index
    %128 = vector.load %arg4[%c0_42, %c0_43, %c0_44] : memref<2x64x32xf32, #tpu.memory_space<vmem>>, vector<1x64x32xf32>
    %129 = vector.shape_cast %128 : vector<1x64x32xf32> to vector<64x32xf32>
    %cst_45 = arith.constant dense<0.000000e+00> : vector<16x32xf32>
    %130 = tpu.matmul %127, %129, %cst_45 {dimension_numbers = #tpu.dot_dimension_numbers<[1], [0], [0], [1], [0, 0, 1, 1], [], []>} : vector<16x64xf32>, vector<64x32xf32>, vector<16x32xf32> -> vector<16x32xf32>
    %131 = vector.broadcast %4 : vector<1x32xf32> to vector<16x32xf32>
    %132 = arith.addf %130, %131 : vector<16x32xf32>
    %133 = arith.addf %120, %132 : vector<16x32xf32>
    %cst_46 = arith.constant dense<0.000000e+00> : vector<16xf32>
    %134 = vector.multi_reduction <add>, %133, %cst_46 [1] : vector<16x32xf32> to vector<16xf32>
    %135 = vector.shape_cast %134 : vector<16xf32> to vector<16x1xf32>
    %cst_47 = arith.constant 3.200000e+01 : f32
    %136 = vector.broadcast %cst_47 : f32 to vector<16x1xf32>
    %137 = arith.divf %135, %136 : vector<16x1xf32>
    %138 = vector.broadcast %137 : vector<16x1xf32> to vector<16x32xf32>
    %139 = arith.subf %133, %138 : vector<16x32xf32>
    %140 = arith.mulf %139, %139 : vector<16x32xf32>
    %cst_48 = arith.constant dense<0.000000e+00> : vector<16xf32>
    %141 = vector.multi_reduction <add>, %140, %cst_48 [1] : vector<16x32xf32> to vector<16xf32>
    %142 = vector.shape_cast %141 : vector<16xf32> to vector<16x1xf32>
    %cst_49 = arith.constant 3.200000e+01 : f32
    %143 = vector.broadcast %cst_49 : f32 to vector<16x1xf32>
    %144 = arith.divf %142, %143 : vector<16x1xf32>
    %145 = vector.broadcast %137 : vector<16x1xf32> to vector<16x32xf32>
    %146 = arith.subf %133, %145 : vector<16x32xf32>
    %cst_50 = arith.constant 9.99999974E-6 : f32
    %147 = vector.broadcast %cst_50 : f32 to vector<16x1xf32>
    %148 = arith.addf %144, %147 : vector<16x1xf32>
    %149 = math.rsqrt %148 : vector<16x1xf32>
    %150 = vector.broadcast %149 : vector<16x1xf32> to vector<16x32xf32>
    %151 = arith.mulf %146, %150 : vector<16x32xf32>
    %152 = vector.broadcast %7 : vector<1x32xf32> to vector<16x32xf32>
    %153 = arith.mulf %151, %152 : vector<16x32xf32>
    %154 = vector.broadcast %8 : vector<1x32xf32> to vector<16x32xf32>
    %155 = arith.addf %153, %154 : vector<16x32xf32>
    %c8 = arith.constant 8 : index
    %c0_51 = arith.constant 0 : index
    %156 = vector.load %arg5[%c8, %c0_51] : memref<16x96xf32, #tpu.memory_space<vmem>>, vector<1x96xf32>
    %c9 = arith.constant 9 : index
    %c0_52 = arith.constant 0 : index
    %157 = vector.load %arg5[%c9, %c0_52] : memref<16x96xf32, #tpu.memory_space<vmem>>, vector<1x32xf32>
    %c10 = arith.constant 10 : index
    %c0_53 = arith.constant 0 : index
    %158 = vector.load %arg5[%c10, %c0_53] : memref<16x96xf32, #tpu.memory_space<vmem>>, vector<1x64xf32>
    %c11 = arith.constant 11 : index
    %c0_54 = arith.constant 0 : index
    %159 = vector.load %arg5[%c11, %c0_54] : memref<16x96xf32, #tpu.memory_space<vmem>>, vector<1x32xf32>
    %c12 = arith.constant 12 : index
    %c0_55 = arith.constant 0 : index
    %160 = vector.load %arg5[%c12, %c0_55] : memref<16x96xf32, #tpu.memory_space<vmem>>, vector<1x32xf32>
    %c13 = arith.constant 13 : index
    %c0_56 = arith.constant 0 : index
    %161 = vector.load %arg5[%c13, %c0_56] : memref<16x96xf32, #tpu.memory_space<vmem>>, vector<1x32xf32>
    %c14 = arith.constant 14 : index
    %c0_57 = arith.constant 0 : index
    %162 = vector.load %arg5[%c14, %c0_57] : memref<16x96xf32, #tpu.memory_space<vmem>>, vector<1x32xf32>
    %c15 = arith.constant 15 : index
    %c0_58 = arith.constant 0 : index
    %163 = vector.load %arg5[%c15, %c0_58] : memref<16x96xf32, #tpu.memory_space<vmem>>, vector<1x32xf32>
    %c1_59 = arith.constant 1 : index
    %c0_60 = arith.constant 0 : index
    %c0_61 = arith.constant 0 : index
    %164 = vector.load %arg1[%c1_59, %c0_60, %c0_61] : memref<2x32x96xf32, #tpu.memory_space<vmem>>, vector<1x32x96xf32>
    %165 = vector.shape_cast %164 : vector<1x32x96xf32> to vector<32x96xf32>
    %cst_62 = arith.constant dense<0.000000e+00> : vector<16x96xf32>
    %166 = tpu.matmul %155, %165, %cst_62 {dimension_numbers = #tpu.dot_dimension_numbers<[1], [0], [0], [1], [0, 0, 1, 1], [], []>} : vector<16x32xf32>, vector<32x96xf32>, vector<16x96xf32> -> vector<16x96xf32>
    %167 = vector.broadcast %156 : vector<1x96xf32> to vector<16x96xf32>
    %168 = arith.addf %166, %167 : vector<16x96xf32>
    %169 = vector.extract_strided_slice %168 {offsets = [0, 0], sizes = [16, 8], strides = [1, 1]} : vector<16x96xf32> to vector<16x8xf32>
    %170 = vector.shape_cast %169 : vector<16x8xf32> to vector<2x8x8xf32>
    %171 = vector.extract_strided_slice %168 {offsets = [0, 8], sizes = [16, 8], strides = [1, 1]} : vector<16x96xf32> to vector<16x8xf32>
    %172 = vector.shape_cast %171 : vector<16x8xf32> to vector<2x8x8xf32>
    %173 = vector.extract_strided_slice %168 {offsets = [0, 16], sizes = [16, 8], strides = [1, 1]} : vector<16x96xf32> to vector<16x8xf32>
    %174 = vector.shape_cast %173 : vector<16x8xf32> to vector<2x8x8xf32>
    %175 = vector.extract_strided_slice %168 {offsets = [0, 24], sizes = [16, 8], strides = [1, 1]} : vector<16x96xf32> to vector<16x8xf32>
    %176 = vector.shape_cast %175 : vector<16x8xf32> to vector<2x8x8xf32>
    %177 = vector.shape_cast %170 : vector<2x8x8xf32> to vector<2x1x8x8xf32>
    %178 = vector.shape_cast %172 : vector<2x8x8xf32> to vector<2x1x8x8xf32>
    %179 = vector.shape_cast %174 : vector<2x8x8xf32> to vector<2x1x8x8xf32>
    %180 = vector.shape_cast %176 : vector<2x8x8xf32> to vector<2x1x8x8xf32>
    %181 = tpu.concatenate %177, %178, %179, %180 in 1 : vector<2x1x8x8xf32>, vector<2x1x8x8xf32>, vector<2x1x8x8xf32>, vector<2x1x8x8xf32> -> vector<2x4x8x8xf32>
    %182 = vector.shape_cast %181 : vector<2x4x8x8xf32> to vector<8x8x8xf32>
    %183 = vector.extract_strided_slice %168 {offsets = [0, 32], sizes = [16, 8], strides = [1, 1]} : vector<16x96xf32> to vector<16x8xf32>
    %184 = vector.shape_cast %183 : vector<16x8xf32> to vector<2x8x8xf32>
    %185 = vector.extract_strided_slice %168 {offsets = [0, 40], sizes = [16, 8], strides = [1, 1]} : vector<16x96xf32> to vector<16x8xf32>
    %186 = vector.shape_cast %185 : vector<16x8xf32> to vector<2x8x8xf32>
    %187 = vector.extract_strided_slice %168 {offsets = [0, 48], sizes = [16, 8], strides = [1, 1]} : vector<16x96xf32> to vector<16x8xf32>
    %188 = vector.shape_cast %187 : vector<16x8xf32> to vector<2x8x8xf32>
    %189 = vector.extract_strided_slice %168 {offsets = [0, 56], sizes = [16, 8], strides = [1, 1]} : vector<16x96xf32> to vector<16x8xf32>
    %190 = vector.shape_cast %189 : vector<16x8xf32> to vector<2x8x8xf32>
    %191 = vector.shape_cast %184 : vector<2x8x8xf32> to vector<2x1x8x8xf32>
    %192 = vector.shape_cast %186 : vector<2x8x8xf32> to vector<2x1x8x8xf32>
    %193 = vector.shape_cast %188 : vector<2x8x8xf32> to vector<2x1x8x8xf32>
    %194 = vector.shape_cast %190 : vector<2x8x8xf32> to vector<2x1x8x8xf32>
    %195 = tpu.concatenate %191, %192, %193, %194 in 1 : vector<2x1x8x8xf32>, vector<2x1x8x8xf32>, vector<2x1x8x8xf32>, vector<2x1x8x8xf32> -> vector<2x4x8x8xf32>
    %196 = vector.shape_cast %195 : vector<2x4x8x8xf32> to vector<8x8x8xf32>
    %197 = vector.extract_strided_slice %168 {offsets = [0, 64], sizes = [16, 8], strides = [1, 1]} : vector<16x96xf32> to vector<16x8xf32>
    %198 = vector.shape_cast %197 : vector<16x8xf32> to vector<2x8x8xf32>
    %199 = vector.extract_strided_slice %168 {offsets = [0, 72], sizes = [16, 8], strides = [1, 1]} : vector<16x96xf32> to vector<16x8xf32>
    %200 = vector.shape_cast %199 : vector<16x8xf32> to vector<2x8x8xf32>
    %201 = vector.extract_strided_slice %168 {offsets = [0, 80], sizes = [16, 8], strides = [1, 1]} : vector<16x96xf32> to vector<16x8xf32>
    %202 = vector.shape_cast %201 : vector<16x8xf32> to vector<2x8x8xf32>
    %203 = vector.extract_strided_slice %168 {offsets = [0, 88], sizes = [16, 8], strides = [1, 1]} : vector<16x96xf32> to vector<16x8xf32>
    %204 = vector.shape_cast %203 : vector<16x8xf32> to vector<2x8x8xf32>
    %205 = vector.shape_cast %198 : vector<2x8x8xf32> to vector<2x1x8x8xf32>
    %206 = vector.shape_cast %200 : vector<2x8x8xf32> to vector<2x1x8x8xf32>
    %207 = vector.shape_cast %202 : vector<2x8x8xf32> to vector<2x1x8x8xf32>
    %208 = vector.shape_cast %204 : vector<2x8x8xf32> to vector<2x1x8x8xf32>
    %209 = tpu.concatenate %205, %206, %207, %208 in 1 : vector<2x1x8x8xf32>, vector<2x1x8x8xf32>, vector<2x1x8x8xf32>, vector<2x1x8x8xf32> -> vector<2x4x8x8xf32>
    %210 = vector.shape_cast %209 : vector<2x4x8x8xf32> to vector<8x8x8xf32>
    "tpu.trace_start"() <{level = 10 : i32, message = "nqd,nkd->nqk"}> : () -> ()
    %cst_63 = arith.constant dense<0.000000e+00> : vector<8x8x8xf32>
    %211 = tpu.matmul %182, %196, %cst_63 {dimension_numbers = #tpu.dot_dimension_numbers<[2], [2], [1], [1], [0, 0, 0, 1, 1, 1], [0], [0]>} : vector<8x8x8xf32>, vector<8x8x8xf32>, vector<8x8x8xf32> -> vector<8x8x8xf32>
    "tpu.trace_stop"() : () -> ()
    %cst_64 = arith.constant 0.353553385 : f32
    %212 = vector.broadcast %cst_64 : f32 to vector<8x8x8xf32>
    %213 = arith.mulf %211, %212 : vector<8x8x8xf32>
    %cst_65 = arith.constant dense<0xFF800000> : vector<8x8xf32>
    %214 = vector.multi_reduction <maximumf>, %213, %cst_65 [2] : vector<8x8x8xf32> to vector<8x8xf32>
    %215 = vector.shape_cast %214 : vector<8x8xf32> to vector<8x8x1xf32>
    %216 = vector.broadcast %215 : vector<8x8x1xf32> to vector<8x8x8xf32>
    %217 = arith.subf %213, %216 : vector<8x8x8xf32>
    %218 = math.exp %217 : vector<8x8x8xf32>
    %cst_66 = arith.constant dense<0.000000e+00> : vector<8x8xf32>
    %219 = vector.multi_reduction <add>, %218, %cst_66 [2] : vector<8x8x8xf32> to vector<8x8xf32>
    %220 = vector.shape_cast %219 : vector<8x8xf32> to vector<8x8x1xf32>
    %221 = vector.broadcast %220 : vector<8x8x1xf32> to vector<8x8x8xf32>
    %222 = arith.divf %218, %221 : vector<8x8x8xf32>
    %c1_67 = arith.constant 1 : index
    %c0_68 = arith.constant 0 : index
    %c0_69 = arith.constant 0 : index
    %c0_70 = arith.constant 0 : index
    %223 = vector.load %arg8[%c1_67, %c0_68, %c0_69, %c0_70] : memref<2x8x8x8xf32, #tpu.memory_space<vmem>>, vector<1x8x8x8xf32>
    %224 = vector.shape_cast %223 : vector<1x8x8x8xf32> to vector<8x8x8xf32>
    %225 = vector.shape_cast %222 : vector<8x8x8xf32> to vector<1x8x8x8xf32>
    tpu.vector_store %arg8[%c1_67, %c0_68, %c0_69, %c0_70], %225 {strides = array<i32>} : memref<2x8x8x8xf32, #tpu.memory_space<vmem>>, vector<1x8x8x8xf32>,
    %226 = vector.shape_cast %222 : vector<8x8x8xf32> to vector<2x4x8x8xf32>
    %cst_71 = arith.constant dense<0.000000e+00> : vector<2x8x8xf32>
    %227 = vector.multi_reduction <add>, %226, %cst_71 [1] : vector<2x4x8x8xf32> to vector<2x8x8xf32>
    %cst_72 = arith.constant 2.500000e-01 : f32
    %228 = vector.broadcast %cst_72 : f32 to vector<2x8x8xf32>
    %229 = arith.mulf %227, %228 : vector<2x8x8xf32>
    %c1_73 = arith.constant 1 : index
    %c0_74 = arith.constant 0 : index
    %c0_75 = arith.constant 0 : index
    %c0_76 = arith.constant 0 : index
    %230 = vector.load %arg9[%c1_73, %c0_74, %c0_75, %c0_76] : memref<2x2x8x8xf32, #tpu.memory_space<vmem>>, vector<1x2x8x8xf32>
    %231 = vector.shape_cast %230 : vector<1x2x8x8xf32> to vector<2x8x8xf32>
    %232 = vector.shape_cast %229 : vector<2x8x8xf32> to vector<1x2x8x8xf32>
    tpu.vector_store %arg9[%c1_73, %c0_74, %c0_75, %c0_76], %232 {strides = array<i32>} : memref<2x2x8x8xf32, #tpu.memory_space<vmem>>, vector<1x2x8x8xf32>,
    "tpu.trace_start"() <{level = 10 : i32, message = "nqk,nkd->nqd"}> : () -> ()
    %cst_77 = arith.constant dense<0.000000e+00> : vector<8x8x8xf32>
    %233 = tpu.matmul %222, %210, %cst_77 {dimension_numbers = #tpu.dot_dimension_numbers<[2], [1], [1], [2], [0, 0, 0, 1, 1, 2], [0], [0]>} : vector<8x8x8xf32>, vector<8x8x8xf32>, vector<8x8x8xf32> -> vector<8x8x8xf32>
    "tpu.trace_stop"() : () -> ()
    %234 = vector.shape_cast %233 : vector<8x8x8xf32> to vector<2x4x8x8xf32>
    %235 = vector.extract_strided_slice %234 {offsets = [0, 0, 0, 0], sizes = [2, 1, 8, 8], strides = [1, 1, 1, 1]} : vector<2x4x8x8xf32> to vector<2x1x8x8xf32>
    %236 = vector.shape_cast %235 : vector<2x1x8x8xf32> to vector<2x8x8xf32>
    %237 = vector.shape_cast %236 : vector<2x8x8xf32> to vector<16x8xf32>
    %238 = vector.extract_strided_slice %234 {offsets = [0, 1, 0, 0], sizes = [2, 1, 8, 8], strides = [1, 1, 1, 1]} : vector<2x4x8x8xf32> to vector<2x1x8x8xf32>
    %239 = vector.shape_cast %238 : vector<2x1x8x8xf32> to vector<2x8x8xf32>
    %240 = vector.shape_cast %239 : vector<2x8x8xf32> to vector<16x8xf32>
    %241 = vector.extract_strided_slice %234 {offsets = [0, 2, 0, 0], sizes = [2, 1, 8, 8], strides = [1, 1, 1, 1]} : vector<2x4x8x8xf32> to vector<2x1x8x8xf32>
    %242 = vector.shape_cast %241 : vector<2x1x8x8xf32> to vector<2x8x8xf32>
    %243 = vector.shape_cast %242 : vector<2x8x8xf32> to vector<16x8xf32>
    %244 = vector.extract_strided_slice %234 {offsets = [0, 3, 0, 0], sizes = [2, 1, 8, 8], strides = [1, 1, 1, 1]} : vector<2x4x8x8xf32> to vector<2x1x8x8xf32>
    %245 = vector.shape_cast %244 : vector<2x1x8x8xf32> to vector<2x8x8xf32>
    %246 = vector.shape_cast %245 : vector<2x8x8xf32> to vector<16x8xf32>
    %247 = tpu.concatenate %237, %240, %243, %246 in 1 : vector<16x8xf32>, vector<16x8xf32>, vector<16x8xf32>, vector<16x8xf32> -> vector<16x32xf32>
    %c1_78 = arith.constant 1 : index
    %c0_79 = arith.constant 0 : index
    %c0_80 = arith.constant 0 : index
    %248 = vector.load %arg2[%c1_78, %c0_79, %c0_80] : memref<2x32x32xf32, #tpu.memory_space<vmem>>, vector<1x32x32xf32>
    %249 = vector.shape_cast %248 : vector<1x32x32xf32> to vector<32x32xf32>
    %cst_81 = arith.constant dense<0.000000e+00> : vector<16x32xf32>
    %250 = tpu.matmul %247, %249, %cst_81 {dimension_numbers = #tpu.dot_dimension_numbers<[1], [0], [0], [1], [0, 0, 1, 1], [], []>} : vector<16x32xf32>, vector<32x32xf32>, vector<16x32xf32> -> vector<16x32xf32>
    %251 = vector.broadcast %157 : vector<1x32xf32> to vector<16x32xf32>
    %252 = arith.addf %250, %251 : vector<16x32xf32>
    %253 = arith.addf %155, %252 : vector<16x32xf32>
    %cst_82 = arith.constant dense<0.000000e+00> : vector<16xf32>
    %254 = vector.multi_reduction <add>, %253, %cst_82 [1] : vector<16x32xf32> to vector<16xf32>
    %255 = vector.shape_cast %254 : vector<16xf32> to vector<16x1xf32>
    %cst_83 = arith.constant 3.200000e+01 : f32
    %256 = vector.broadcast %cst_83 : f32 to vector<16x1xf32>
    %257 = arith.divf %255, %256 : vector<16x1xf32>
    %258 = vector.broadcast %257 : vector<16x1xf32> to vector<16x32xf32>
    %259 = arith.subf %253, %258 : vector<16x32xf32>
    %260 = arith.mulf %259, %259 : vector<16x32xf32>
    %cst_84 = arith.constant dense<0.000000e+00> : vector<16xf32>
    %261 = vector.multi_reduction <add>, %260, %cst_84 [1] : vector<16x32xf32> to vector<16xf32>
    %262 = vector.shape_cast %261 : vector<16xf32> to vector<16x1xf32>
    %cst_85 = arith.constant 3.200000e+01 : f32
    %263 = vector.broadcast %cst_85 : f32 to vector<16x1xf32>
    %264 = arith.divf %262, %263 : vector<16x1xf32>
    %265 = vector.broadcast %257 : vector<16x1xf32> to vector<16x32xf32>
    %266 = arith.subf %253, %265 : vector<16x32xf32>
    %cst_86 = arith.constant 9.99999974E-6 : f32
    %267 = vector.broadcast %cst_86 : f32 to vector<16x1xf32>
    %268 = arith.addf %264, %267 : vector<16x1xf32>
    %269 = math.rsqrt %268 : vector<16x1xf32>
    %270 = vector.broadcast %269 : vector<16x1xf32> to vector<16x32xf32>
    %271 = arith.mulf %266, %270 : vector<16x32xf32>
    %272 = vector.broadcast %160 : vector<1x32xf32> to vector<16x32xf32>
    %273 = arith.mulf %271, %272 : vector<16x32xf32>
    %274 = vector.broadcast %161 : vector<1x32xf32> to vector<16x32xf32>
    %275 = arith.addf %273, %274 : vector<16x32xf32>
    %c1_87 = arith.constant 1 : index
    %c0_88 = arith.constant 0 : index
    %c0_89 = arith.constant 0 : index
    %276 = vector.load %arg3[%c1_87, %c0_88, %c0_89] : memref<2x32x64xf32, #tpu.memory_space<vmem>>, vector<1x32x64xf32>
    %277 = vector.shape_cast %276 : vector<1x32x64xf32> to vector<32x64xf32>
    %cst_90 = arith.constant dense<0.000000e+00> : vector<16x64xf32>
    %278 = tpu.matmul %275, %277, %cst_90 {dimension_numbers = #tpu.dot_dimension_numbers<[1], [0], [0], [1], [0, 0, 1, 1], [], []>} : vector<16x32xf32>, vector<32x64xf32>, vector<16x64xf32> -> vector<16x64xf32>
    %279 = vector.broadcast %158 : vector<1x64xf32> to vector<16x64xf32>
    %280 = arith.addf %278, %279 : vector<16x64xf32>
    %cst_91 = arith.constant 0.000000e+00 : f32
    %281 = vector.broadcast %cst_91 : f32 to vector<16x64xf32>
    %282 = arith.maximumf %280, %281 : vector<16x64xf32>
    %c1_92 = arith.constant 1 : index
    %c0_93 = arith.constant 0 : index
    %c0_94 = arith.constant 0 : index
    %283 = vector.load %arg4[%c1_92, %c0_93, %c0_94] : memref<2x64x32xf32, #tpu.memory_space<vmem>>, vector<1x64x32xf32>
    %284 = vector.shape_cast %283 : vector<1x64x32xf32> to vector<64x32xf32>
    %cst_95 = arith.constant dense<0.000000e+00> : vector<16x32xf32>
    %285 = tpu.matmul %282, %284, %cst_95 {dimension_numbers = #tpu.dot_dimension_numbers<[1], [0], [0], [1], [0, 0, 1, 1], [], []>} : vector<16x64xf32>, vector<64x32xf32>, vector<16x32xf32> -> vector<16x32xf32>
    %286 = vector.broadcast %159 : vector<1x32xf32> to vector<16x32xf32>
    %287 = arith.addf %285, %286 : vector<16x32xf32>
    %288 = arith.addf %275, %287 : vector<16x32xf32>
    %cst_96 = arith.constant dense<0.000000e+00> : vector<16xf32>
    %289 = vector.multi_reduction <add>, %288, %cst_96 [1] : vector<16x32xf32> to vector<16xf32>
    %290 = vector.shape_cast %289 : vector<16xf32> to vector<16x1xf32>
    %cst_97 = arith.constant 3.200000e+01 : f32
    %291 = vector.broadcast %cst_97 : f32 to vector<16x1xf32>
    %292 = arith.divf %290, %291 : vector<16x1xf32>
    %293 = vector.broadcast %292 : vector<16x1xf32> to vector<16x32xf32>
    %294 = arith.subf %288, %293 : vector<16x32xf32>
    %295 = arith.mulf %294, %294 : vector<16x32xf32>
    %cst_98 = arith.constant dense<0.000000e+00> : vector<16xf32>
    %296 = vector.multi_reduction <add>, %295, %cst_98 [1] : vector<16x32xf32> to vector<16xf32>
    %297 = vector.shape_cast %296 : vector<16xf32> to vector<16x1xf32>
    %cst_99 = arith.constant 3.200000e+01 : f32
    %298 = vector.broadcast %cst_99 : f32 to vector<16x1xf32>
    %299 = arith.divf %297, %298 : vector<16x1xf32>
    %300 = vector.broadcast %292 : vector<16x1xf32> to vector<16x32xf32>
    %301 = arith.subf %288, %300 : vector<16x32xf32>
    %cst_100 = arith.constant 9.99999974E-6 : f32
    %302 = vector.broadcast %cst_100 : f32 to vector<16x1xf32>
    %303 = arith.addf %299, %302 : vector<16x1xf32>
    %304 = math.rsqrt %303 : vector<16x1xf32>
    %305 = vector.broadcast %304 : vector<16x1xf32> to vector<16x32xf32>
    %306 = arith.mulf %301, %305 : vector<16x32xf32>
    %307 = vector.broadcast %162 : vector<1x32xf32> to vector<16x32xf32>
    %308 = arith.mulf %306, %307 : vector<16x32xf32>
    %309 = vector.broadcast %163 : vector<1x32xf32> to vector<16x32xf32>
    %310 = arith.addf %308, %309 : vector<16x32xf32>
    %c0_101 = arith.constant 0 : index
    %c0_102 = arith.constant 0 : index
    %311 = vector.load %arg6[%c0_101, %c0_102] : memref<2x32xf32, #tpu.memory_space<vmem>>, vector<1x32xf32>
    %c1_103 = arith.constant 1 : index
    %c0_104 = arith.constant 0 : index
    %312 = vector.load %arg6[%c1_103, %c0_104] : memref<2x32xf32, #tpu.memory_space<vmem>>, vector<1x32xf32>
    %cst_105 = arith.constant dense<0.000000e+00> : vector<16xf32>
    %313 = vector.multi_reduction <add>, %310, %cst_105 [1] : vector<16x32xf32> to vector<16xf32>
    %314 = vector.shape_cast %313 : vector<16xf32> to vector<16x1xf32>
    %cst_106 = arith.constant 3.200000e+01 : f32
    %315 = vector.broadcast %cst_106 : f32 to vector<16x1xf32>
    %316 = arith.divf %314, %315 : vector<16x1xf32>
    %317 = vector.broadcast %316 : vector<16x1xf32> to vector<16x32xf32>
    %318 = arith.subf %310, %317 : vector<16x32xf32>
    %319 = arith.mulf %318, %318 : vector<16x32xf32>
    %cst_107 = arith.constant dense<0.000000e+00> : vector<16xf32>
    %320 = vector.multi_reduction <add>, %319, %cst_107 [1] : vector<16x32xf32> to vector<16xf32>
    %321 = vector.shape_cast %320 : vector<16xf32> to vector<16x1xf32>
    %cst_108 = arith.constant 3.200000e+01 : f32
    %322 = vector.broadcast %cst_108 : f32 to vector<16x1xf32>
    %323 = arith.divf %321, %322 : vector<16x1xf32>
    %324 = vector.broadcast %316 : vector<16x1xf32> to vector<16x32xf32>
    %325 = arith.subf %310, %324 : vector<16x32xf32>
    %cst_109 = arith.constant 9.99999974E-6 : f32
    %326 = vector.broadcast %cst_109 : f32 to vector<16x1xf32>
    %327 = arith.addf %323, %326 : vector<16x1xf32>
    %328 = math.rsqrt %327 : vector<16x1xf32>
    %329 = vector.broadcast %328 : vector<16x1xf32> to vector<16x32xf32>
    %330 = arith.mulf %325, %329 : vector<16x32xf32>
    %331 = vector.broadcast %311 : vector<1x32xf32> to vector<16x32xf32>
    %332 = arith.mulf %330, %331 : vector<16x32xf32>
    %333 = vector.broadcast %312 : vector<1x32xf32> to vector<16x32xf32>
    %334 = arith.addf %332, %333 : vector<16x32xf32>
    %c0_110 = arith.constant 0 : index
    %c0_111 = arith.constant 0 : index
    %335 = vector.load %arg7[%c0_110, %c0_111] : memref<16x32xf32, #tpu.memory_space<vmem>>, vector<16x32xf32>
    tpu.vector_store %arg7[%c0_110, %c0_111], %334 {strides = array<i32>} : memref<16x32xf32, #tpu.memory_space<vmem>>, vector<16x32xf32>,
    return
  }
}

</mosaic_0001>

<bundles_post_ra>
// kernel: transformer_encoder_forward.1
= control target key start
LH: loop header
LB: loop body
LE: loop exit
PB: predicated region body
PF: predicated region fallthrough
CT: control target
= control target key end

     0   :  { %vm47_vm0 = vcmask 261120   ;;  %v4431_v10 = vmov 0.0   ;;  %s4432_s23 = smov 104   ;;  %vm4434_vm1 = vmmov 0   ;;  %s4435_s24 = smov 112   ;;  %vm145_vm2 = vcmask 64512   ;;  %s5207_s1 = inlined_call_operand.vmem [shape: f32[2,32,96], index: 1, kind: input, shape index: {}]   ;;  %s5208_s0 = inlined_call_operand.vmem [shape: f32[16,32], index: 0, kind: input, shape index: {}]   ;;  %s5209_s5 = inlined_call_operand.vmem [shape: f32[16,96], index: 5, kind: input, shape index: {}]   ;;  %s5210_s8 = inlined_call_operand.vmem [shape: f32[2,8,8,8], index: 8, kind: output, shape index: {1}]   ;;  %s5211_s9 = inlined_call_operand.vmem [shape: f32[2,2,8,8], index: 9, kind: output, shape index: {2}]   ;;  %s5212_s2 = inlined_call_operand.vmem [shape: f32[2,32,32], index: 2, kind: input, shape index: {}]   ;;  %s5213_s3 = inlined_call_operand.vmem [shape: f32[2,32,64], index: 3, kind: input, shape index: {}]   ;;  %s5214_s4 = inlined_call_operand.vmem [shape: f32[2,64,32], index: 4, kind: input, shape index: {}]   ;;  %s5215_s6 = inlined_call_operand.vmem [shape: f32[2,32], index: 6, kind: input, shape index: {}]   ;;  %s5216_s7 = inlined_call_operand.vmem [shape: f32[16,32], index: 7, kind: output, shape index: {0}]  }
   0x1   :  { %v39_v0 = vld [vmem:[%s5207_s1] sm:$0xff]  ;;  %v40_v1 = vld [vmem:[%s5207_s1 + $0x8] sm:$0xff]  ;;  %v41_v2 = vld [vmem:[%s5207_s1 + $0x10] sm:$0xff]  ;;  %4014 = vmatprep.subr.mxu0 %v4431_v10  ;;  %4016 = vmatprep.mubr.msk.f32.mxu0 %vm4434_vm1, %v4431_v10  ;;  %s4436_s25 = smov 96   ;;  %s4437_s26 = smov 64   ;;  %vm1508_vm3 = vcmask 130048  }
   0x2   :  { %v4257_v3 = vpack.c.bf16 %v40_v1, %v39_v0  ;;  %v42_v4 = vld [vmem:[%s5207_s1 + $0x18] sm:$0xff]  ;;  %v4506_v5 = vld [vmem:[%s5208_s0] sm:$0xff]  ;;  %v4513_v7 = vld [vmem:[%s5208_s0 + $0x8] sm:$0xff]  ;;  %s4433_s0 = smov 120   ;;  %s4438_s13 = smov 8   ;;  %vm1511_vm4 = vcmask 195584  }
   0x3   :  { %v4261_v6 = vpack.c.bf16 %v42_v4, %v41_v2  ;;  %4001 = vmatprep.mubr.msk.f32.mxu1 %vm47_vm0, %v4506_v5  ;;  %v3761_v8 = vld [vmem:[%s5209_s5] ss:$0 sm:$0xff]  ;;  %s4439_s18 = smov 16   ;;  %s4440_s19 = smov 24   ;;  %vm1747_vm5 = vcmask 523264  }
   0x4   :  { %4258 = vmatprep.subr.bf16.mxu1 %v4257_v3 }
   0x5   :  { %4260 = vmatpush3.bf16.msra.mxu1 %v4257_v3 }
   0x6   :  { %4262 = vmatprep.subr.bf16.mxu1 %v4261_v6 }
   0x9   :  { %4264 = vmatpush3.bf16.msra.mxu1 %v4261_v6 }
   0xa   :  { %4004 = vmatprep.subr.mxu1 %v4431_v10 }
   0xc   :  { %4002 = vmatmul.mubr.msk.f32.vlgmr.msra.gmra.mrb[0].mxu1 %vm47_vm0, %v4513_v7 }
   0xd   :  { %4006 = vmatprep.mubr.msk.f32.mxu1 %vm4434_vm1, %v4431_v10 }
  0xdf   :  { %v4003_v9 = vpop.f32.mrb[0].mxu1 }
  0xe0   :  { %v120_v11 = vpop.f32.mrb[1].mxu1  ;;  %v4532_v13 = vadd.f32 %v4003_v9, %v3761_v8 }
  0xe1   :  { %v4522_v12 = vadd.f32 %v3761_v8, %v120_v11 }
  0xe3   :  { %139 = vrot.lane.b32.xlu1 %v4522_v12, %s4432_s23  ;;  %131 = vrot.lane.b32.xlu0 %v4522_v12, %s4433_s0 }
  0xe7   :  { %133 = vrot.lane.b32.xlu1 %v4532_v13, %s4433_s0  ;;  %135 = vrot.lane.b32.xlu0 %v4522_v12, %s4435_s24 }
  0xeb   :  { %141 = vrot.lane.b32.xlu1 %v4532_v13, %s4432_s23  ;;  %137 = vrot.lane.b32.xlu0 %v4532_v13, %s4435_s24 }
  0xef   :  { %143 = vrot.lane.b32.xlu0 %v4522_v12, %s4436_s25 }
 0x155   :  { %v4544_v14 = vpop.permute.xlu1 %139  ;;  %v4546_v15 = vpop.permute.xlu0 %131 }
 0x156   :  { %220 = vrot.lane.b32.xlu1 %v4546_v15, %s4436_s25 }
 0x159   :  { %v4550_v16 = vpop.permute.xlu0 %135  ;;  %v4556_v17 = vpop.permute.xlu1 %133 }
 0x15a   :  { %372 = vrot.lane.b32.xlu1 %v4544_v14, %s4436_s25  ;;  %296 = vrot.lane.b32.xlu0 %v4550_v16, %s4436_s25 }
 0x15d   :  { %v4558_v18 = vpop.permute.xlu0 %137  ;;  %v4564_v19 = vpop.permute.xlu1 %141 }
 0x15e   :  { %524 = vrot.lane.b32.xlu1 %v4556_v17, %s4436_s25  ;;  %448 = vrot.lane.b32.xlu0 %v4532_v13, %s4436_s25 }
 0x161   :  { %v144_v20 = vpop.permute.xlu0 %143 }
 0x162   :  { %676 = vrot.lane.b32.xlu1 %v4564_v19, %s4436_s25  ;;  %600 = vrot.lane.b32.xlu0 %v4558_v18, %s4436_s25 }
 0x163   :  { %4005 = vmatpush3.xpose.msk.msra.mxu1 %vm145_vm2, %v144_v20 }
 0x164   :  { %4009 = vmatprep.subr.mxu1 %v4431_v10 }
 0x166   :  { %4007 = vmatmul.mubr.msk.f32.vlgmr.msra.gmra.mrb[2].mxu1 %vm145_vm2, %v4522_v12 }
 0x167   :  { %4011 = vmatprep.mubr.msk.f32.mxu1 %vm4434_vm1, %v4431_v10 }
 0x1c8   :  { %v221_v21 = vpop.permute.xlu1 %220 }
 0x1c9   :  { %4010 = vmatpush3.xpose.msk.msra.mxu1 %vm145_vm2, %v221_v21 }
 0x1ca   :  { %4019 = vmatprep.subr.mxu1 %v4431_v10 }
 0x1cc   :  { %v373_v22 = vpop.permute.xlu1 %372  ;;  %4012 = vmatmul.mubr.msk.f32.vlgmr.msra.gmra.mrb[4].mxu1 %vm145_vm2, %v4546_v15  ;;  %v297_v23 = vpop.permute.xlu0 %296 }
 0x1cd   :  { %4015 = vmatpush3.xpose.msk.msra.mxu0 %vm145_vm2, %v297_v23  ;;  %4020 = vmatpush3.xpose.msk.msra.mxu1 %vm145_vm2, %v373_v22 }
 0x1ce   :  { %4021 = vmatprep.mubr.msk.f32.mxu1 %vm4434_vm1, %v4431_v10  ;;  %4024 = vmatprep.subr.mxu0 %v4431_v10 }
 0x1cf   :  { %4029 = vmatprep.subr.mxu1 %v4431_v10 }
 0x1d0   :  { %v525_v24 = vpop.permute.xlu1 %524  ;;  %4017 = vmatmul.mubr.msk.f32.vlgmr.msra.gmra.mrb[0].mxu0 %vm145_vm2, %v4550_v16  ;;  %4022 = vmatmul.mubr.msk.f32.vlgmr.msra.gmra.mrb[6].mxu1 %vm145_vm2, %v4544_v14  ;;  %v449_v25 = vpop.permute.xlu0 %448 }
 0x1d1   :  { %4025 = vmatpush3.xpose.msk.msra.mxu0 %vm145_vm2, %v449_v25  ;;  %4030 = vmatpush3.xpose.msk.msra.mxu1 %vm145_vm2, %v525_v24 }
 0x1d2   :  { %4026 = vmatprep.mubr.msk.f32.mxu0 %vm4434_vm1, %v4431_v10  ;;  %4031 = vmatprep.mubr.msk.f32.mxu1 %vm4434_vm1, %v4431_v10 }
 0x1d3   :  { %4034 = vmatprep.subr.mxu0 %v4431_v10  ;;  %4039 = vmatprep.subr.mxu1 %v4431_v10 }
 0x1d4   :  { %v677_v26 = vpop.permute.xlu1 %676  ;;  %4027 = vmatmul.mubr.msk.f32.vlgmr.msra.gmra.mrb[2].mxu0 %vm145_vm2, %v4532_v13  ;;  %4032 = vmatmul.mubr.msk.f32.vlgmr.msra.gmra.mrb[8].mxu1 %vm145_vm2, %v4556_v17  ;;  %v601_v27 = vpop.permute.xlu0 %600 }
 0x1d5   :  { %4035 = vmatpush3.xpose.msk.msra.mxu0 %vm145_vm2, %v601_v27  ;;  %4040 = vmatpush3.xpose.msk.msra.mxu1 %vm145_vm2, %v677_v26 }
 0x1d6   :  { %4036 = vmatprep.mubr.msk.f32.mxu0 %vm4434_vm1, %v4431_v10  ;;  %4041 = vmatprep.mubr.msk.f32.mxu1 %vm4434_vm1, %v4431_v10 }
 0x1d7   :  { %4044 = vmatprep.subr.mxu0 %v4431_v10  ;;  %4049 = vmatprep.subr.mxu1 %v4431_v10 }
 0x1d8   :  { %4037 = vmatmul.mubr.msk.f32.vlgmr.msra.gmra.mrb[4].mxu0 %vm145_vm2, %v4558_v18  ;;  %4042 = vmatmul.mubr.msk.f32.vlgmr.msra.gmra.mrb[10].mxu1 %vm145_vm2, %v4564_v19 }
 0x1d9   :  { %4046 = vmatprep.mubr.msk.f32.mxu0 %vm4434_vm1, %v4431_v10  ;;  %4051 = vmatprep.mubr.msk.f32.mxu1 %vm4434_vm1, %v4431_v10 }
 0x239   :  { %v216_v28 = vpop.f32.mrb[2].mxu1 }
 0x23a   :  { %v752_v29 = vmul.f32 0.35355338, %v216_v28  ;;  %v4008_v30 = vpop.f32.mrb[3].mxu1 }
 0x23c   :  { %v760_v31 = vsel %vm145_vm2, %v752_v29, -inf }
 0x23d   :  { %761 = vmax.xlane.f32.xlu0 %v760_v31 }
 0x29f   :  { %v292_v32 = vpop.f32.mrb[4].mxu1 }
 0x2a0   :  { %v753_v33 = vmul.f32 0.35355338, %v292_v32  ;;  %v4013_v34 = vpop.f32.mrb[5].mxu1 }
 0x2a2   :  { %v763_v35 = vsel %vm145_vm2, %v753_v33, -inf }
 0x2a3   :  { %764 = vmax.xlane.f32.xlu1 %v763_v35  ;;  %v368_v36 = vpop.f32.mrb[0].mxu0  ;;  %v444_v37 = vpop.f32.mrb[6].mxu1 }
 0x2a4   :  { %v754_v38 = vmul.f32 0.35355338, %v368_v36  ;;  %v4018_v39 = vpop.f32.mrb[1].mxu0  ;;  %v4023_v40 = vpop.f32.mrb[7].mxu1  ;;  %v755_v41 = vmul.f32 0.35355338, %v444_v37 }
 0x2a6   :  { %v766_v42 = vsel %vm145_vm2, %v754_v38, -inf  ;;  %v769_v49 = vsel %vm145_vm2, %v755_v41, -inf }
 0x2a7   :  { %v596_v43 = vpop.f32.mrb[8].mxu1  ;;  %767 = vmax.xlane.f32.xlu0 %v766_v42  ;;  %v520_v44 = vpop.f32.mrb[2].mxu0 }
 0x2a8   :  { %v756_v45 = vmul.f32 0.35355338, %v520_v44  ;;  %v4028_v46 = vpop.f32.mrb[3].mxu0  ;;  %v4033_v47 = vpop.f32.mrb[9].mxu1  ;;  %v757_v48 = vmul.f32 0.35355338, %v596_v43 }
 0x2aa   :  { %v772_v50 = vsel %vm145_vm2, %v756_v45, -inf  ;;  %v775_v57 = vsel %vm145_vm2, %v757_v48, -inf }
 0x2ab   :  { %v748_v51 = vpop.f32.mrb[10].mxu1  ;;  %770 = vmax.xlane.f32.xlu0 %v769_v49  ;;  %773 = vmax.xlane.f32.xlu1 %v772_v50  ;;  %v672_v52 = vpop.f32.mrb[4].mxu0 }
 0x2ac   :  { %v758_v53 = vmul.f32 0.35355338, %v672_v52  ;;  %v4038_v54 = vpop.f32.mrb[5].mxu0  ;;  %v4043_v55 = vpop.f32.mrb[11].mxu1  ;;  %v759_v56 = vmul.f32 0.35355338, %v748_v51 }
 0x2ae   :  { %v778_v58 = vsel %vm145_vm2, %v758_v53, -inf  ;;  %v781_v59 = vsel %vm145_vm2, %v759_v56, -inf }
 0x2af   :  { %776 = vmax.xlane.f32.xlu0 %v775_v57  ;;  %779 = vmax.xlane.f32.xlu1 %v778_v58 }
 0x2b3   :  { %782 = vmax.xlane.f32.xlu0 %v781_v59 }
 0x2c0   :  { %874 = vrot.lane.b32.xlu1 %v4522_v12, %s4437_s26 }
 0x2c4   :  { %1026 = vrot.lane.b32.xlu1 %v4550_v16, %s4437_s26 }
 0x2c8   :  { %1102 = vrot.lane.b32.xlu1 %v4544_v14, %s4437_s26 }
 0x2c9   :  { %950 = vrot.lane.b32.xlu0 %v4546_v15, %s4437_s26 }
 0x2ca   :  { %v762_v60 = vpop.xlane.xlu0 %761 }
 0x2cb   :  { %v784_v61 = vsub.f32 %v752_v29, %v762_v60 }
 0x2cc   :  { %1254 = vrot.lane.b32.xlu1 %v4556_v17, %s4437_s26 }
 0x2cd   :  { %1178 = vrot.lane.b32.xlu0 %v4532_v13, %s4437_s26  ;;  %v792_v62 = vmul.f32 1.442695, %v784_v61 }
 0x2cf   :  { %4347 = vpow2.f32 %v792_v62 }
 0x2d9   :  { %v4638_v63 = vpop.eup %4347 }
 0x2da   :  { %v808_v0 = vsel %vm145_vm2, %v4638_v63, 0.0 }
 0x2f0   :  { %809 = vadd.xlane.f32.xlu1 %v808_v0 }
 0x330   :  { %v765_v1 = vpop.xlane.xlu1 %764 }
 0x331   :  { %v785_v2 = vsub.f32 %v753_v33, %v765_v1 }
 0x333   :  { %v794_v3 = vmul.f32 1.442695, %v785_v2 }
 0x334   :  { %v768_v4 = vpop.xlane.xlu0 %767 }
 0x335   :  { %4349 = vpow2.f32 %v794_v3  ;;  %v786_v6 = vsub.f32 %v754_v38, %v768_v4 }
 0x337   :  { %v796_v8 = vmul.f32 1.442695, %v786_v6 }
 0x338   :  { %v774_v9 = vpop.xlane.xlu1 %773  ;;  %v771_v11 = vpop.xlane.xlu0 %770 }
 0x339   :  { %4351 = vpow2.f32 %v796_v8  ;;  %v788_v12 = vsub.f32 %v756_v45, %v774_v9  ;;  %v787_v13 = vsub.f32 %v755_v41, %v771_v11 }
 0x33b   :  { %v800_v14 = vmul.f32 1.442695, %v788_v12  ;;  %v798_v15 = vmul.f32 1.442695, %v787_v13 }
 0x33c   :  { %v780_v16 = vpop.xlane.xlu1 %779  ;;  %v777_v17 = vpop.xlane.xlu0 %776 }
 0x33d   :  { %4353 = vpow2.f32 %v800_v14  ;;  %v790_v20 = vsub.f32 %v758_v53, %v780_v16  ;;  %v789_v21 = vsub.f32 %v757_v48, %v777_v17 }
 0x33e   :  { %4355 = vpow2.f32 %v798_v15 }
 0x33f   :  { %v4350_v22 = vpop.eup %4349  ;;  %v804_v23 = vmul.f32 1.442695, %v790_v20  ;;  %v802_v24 = vmul.f32 1.442695, %v789_v21 }
 0x340   :  { %v875_v25 = vpop.permute.xlu1 %874  ;;  %v783_v26 = vpop.xlane.xlu0 %782  ;;  %v811_v27 = vsel %vm145_vm2, %v4350_v22, 0.0 }
 0x341   :  { %4357 = vpow2.f32 %v804_v23  ;;  %v791_v28 = vsub.f32 %v759_v56, %v783_v26  ;;  %812 = vadd.xlane.f32.xlu0 %v811_v27  ;;  %4045 = vmatpush3.msra.mxu0 %v875_v25 }
 0x342   :  { %4359 = vpow2.f32 %v802_v24  ;;  %4054 = vmatprep.subr.mxu0 %v4431_v10 }
 0x343   :  { %v4352_v29 = vpop.eup %4351  ;;  %v806_v30 = vmul.f32 1.442695, %v791_v28 }
 0x344   :  { %v951_v31 = vpop.permute.xlu0 %950  ;;  %v814_v32 = vsel %vm145_vm2, %v4352_v29, 0.0  ;;  %v1027_v43 = vpop.permute.xlu1 %1026 }
 0x345   :  { %4361 = vpow2.f32 %v806_v30  ;;  %815 = vadd.xlane.f32.xlu1 %v814_v32  ;;  %4050 = vmatpush3.msra.mxu1 %v951_v31  ;;  %v1514_v31 = vld [vmem:[%s5212_s2] sm:$0xff]  ;;  %v1515_v32 = vld [vmem:[%s5212_s2 + $0x8] sm:$0xff] }
 0x346   :  { %4059 = vmatprep.subr.mxu1 %v4431_v10 }
 0x347   :  { %v4646_v33 = vpop.eup %4353 }
 0x348   :  { %v4648_v34 = vpop.eup %4355  ;;  %v820_v35 = vsel %vm145_vm2, %v4646_v33, 0.0  ;;  %v1103_v44 = vpop.permute.xlu1 %1102 }
 0x349   :  { %821 = vadd.xlane.f32.xlu1 %v820_v35  ;;  %v817_v36 = vsel %vm145_vm2, %v4648_v34, 0.0 }
 0x34a   :  { %818 = vadd.xlane.f32.xlu0 %v817_v36  ;;  %v1516_v36 = vld [vmem:[%s5212_s2 + $0x10] sm:$0xff] }
 0x34b   :  { %v4654_v37 = vpop.eup %4357 }
 0x34c   :  { %v4656_v38 = vpop.eup %4359  ;;  %v826_v39 = vsel %vm145_vm2, %v4654_v37, 0.0  ;;  %v1255_v45 = vpop.permute.xlu1 %1254 }
 0x34d   :  { %827 = vadd.xlane.f32.xlu1 %v826_v39  ;;  %v823_v40 = vsel %vm145_vm2, %v4656_v38, 0.0 }
 0x34e   :  { %824 = vadd.xlane.f32.xlu0 %v823_v40 }
 0x34f   :  { %v4662_v41 = vpop.eup %4361 }
 0x350   :  { %v829_v42 = vsel %vm145_vm2, %v4662_v41, 0.0 }
 0x352   :  { %830 = vadd.xlane.f32.xlu0 %v829_v42 }
 0x35e   :  { %1406 = vrot.lane.b32.xlu1 %v4564_v19, %s4437_s26 }
 0x368   :  { %1330 = vrot.lane.b32.xlu0 %v4558_v18, %s4437_s26  ;;  %v1179_v18 = vpop.permute.xlu0 %1178 }
 0x37d   :  { %v810_v46 = vpop.xlane.xlu1 %809 }
 0x37e   :  { %4363 = vrcp.f32 %v810_v46 }
 0x388   :  { %v4364_v47 = vpop.eup %4363 }
 0x389   :  { %v833_v48 = vmul.f32 %v4364_v47, %v4638_v63 }
 0x38b   :  { %848 = vst.msk [vmem:[%s5210_s8] sm:$0xff] %vm145_vm2, %v833_v48  ;;  %4047 = vmatmul.mubr.msk.f32.vlgmr.msra.gmra.mrb[6].mxu0 %vm145_vm2, %v833_v48  ;;  %v856_v61 = vsel %vm145_vm2, %v833_v48, 0.0 }
 0x38c   :  { %4055 = vmatpush3.msra.mxu0 %v1027_v43  ;;  %4056 = vmatprep.mubr.msk.f32.mxu0 %vm4434_vm1, %v4431_v10 }
 0x38d   :  { %4064 = vmatprep.subr.mxu0 %v4431_v10 }
 0x3ce   :  { %v813_v19 = vpop.xlane.xlu0 %812 }
 0x3cf   :  { %4365 = vrcp.f32 %v813_v19 }
 0x3d2   :  { %v816_v49 = vpop.xlane.xlu1 %815 }
 0x3d3   :  { %4367 = vrcp.f32 %v816_v49 }
 0x3d6   :  { %v822_v50 = vpop.xlane.xlu1 %821 }
 0x3d7   :  { %4369 = vrcp.f32 %v822_v50  ;;  %v819_v51 = vpop.xlane.xlu0 %818 }
 0x3d8   :  { %4371 = vrcp.f32 %v819_v51 }
 0x3d9   :  { %v4366_v52 = vpop.eup %4365 }
 0x3da   :  { %v835_v53 = vmul.f32 %v4366_v52, %v4350_v22  ;;  %v828_v54 = vpop.xlane.xlu1 %827 }
 0x3db   :  { %4373 = vrcp.f32 %v828_v54  ;;  %v825_v55 = vpop.xlane.xlu0 %824 }
 0x3dc   :  { %849 = vst.msk [vmem:[%s5210_s8 + $0x8] sm:$0xff] %vm145_vm2, %v835_v53  ;;  %4375 = vrcp.f32 %v825_v55  ;;  %4052 = vmatmul.mubr.msk.f32.vlgmr.msra.gmra.mrb[12].mxu1 %vm145_vm2, %v835_v53  ;;  %v857_v58 = vsel %vm145_vm2, %v835_v53, 0.0 }
 0x3dd   :  { %v4368_v56 = vpop.eup %4367  ;;  %4060 = vmatpush3.msra.mxu1 %v1103_v44  ;;  %4061 = vmatprep.mubr.msk.f32.mxu1 %vm4434_vm1, %v4431_v10  ;;  %v858_v0 = vadd.f32 %v857_v58, %v856_v61 }
 0x3de   :  { %v837_v57 = vmul.f32 %v4368_v56, %v4352_v29  ;;  %4069 = vmatprep.subr.mxu1 %v4431_v10  ;;  %v1407_v17 = vpop.permute.xlu1 %1406 }
 0x3df   :  { %v831_v59 = vpop.xlane.xlu0 %830 }
 0x3e0   :  { %850 = vst.msk [vmem:[%s5210_s8 + $0x10] sm:$0xff] %vm145_vm2, %v837_v57  ;;  %4377 = vrcp.f32 %v831_v59  ;;  %4057 = vmatmul.mubr.msk.f32.vlgmr.msra.gmra.mrb[8].mxu0 %vm145_vm2, %v837_v57  ;;  %v859_v62 = vsel %vm145_vm2, %v837_v57, 0.0 }
 0x3e1   :  { %v4370_v60 = vpop.eup %4369  ;;  %4065 = vmatpush3.msra.mxu0 %v1179_v18  ;;  %4066 = vmatprep.mubr.msk.f32.mxu0 %vm4434_vm1, %v4431_v10  ;;  %v860_v4 = vadd.f32 %v859_v62, %v858_v0 }
 0x3e2   :  { %v4372_v63 = vpop.eup %4371  ;;  %v841_v1 = vmul.f32 %v4370_v60, %v4646_v33  ;;  %4074 = vmatprep.subr.mxu0 %v4431_v10  ;;  %v3788_v60 = vld [vmem:[%s5209_s5 + $0x1] ss:$0 sm:$0xff] }
 0x3e3   :  { %v839_v2 = vmul.f32 %v4372_v63, %v4648_v34  ;;  %v1331_v3 = vpop.permute.xlu0 %1330  ;;  %v4265_v34 = vpack.c.bf16 %v1515_v32, %v1514_v31  ;;  %v1740_v31 = vld [vmem:[%s5214_s4 + $0x28] sm:$0xff] }
 0x3e4   :  { %852 = vst.msk [vmem:[%s5210_s8 + $0x20] sm:$0xff] %vm145_vm2, %v841_v1  ;;  %4067 = vmatmul.mubr.msk.f32.vlgmr.msra.gmra.mrb[10].mxu0 %vm145_vm2, %v841_v1  ;;  %v863_v15 = vsel %vm145_vm2, %v841_v1, 0.0 }
 0x3e5   :  { %v4374_v6 = vpop.eup %4373  ;;  %851 = vst.msk [vmem:[%s5210_s8 + $0x18] sm:$0xff] %vm145_vm2, %v839_v2  ;;  %v861_v8 = vsel %vm145_vm2, %v839_v2, 0.0  ;;  %4062 = vmatmul.mubr.msk.f32.vlgmr.msra.gmra.mrb[14].mxu1 %vm145_vm2, %v839_v2  ;;  %4075 = vmatpush3.msra.mxu0 %v1331_v3 }
 0x3e6   :  { %v4376_v9 = vpop.eup %4375  ;;  %v862_v11 = vadd.f32 %v861_v8, %v860_v4  ;;  %v845_v12 = vmul.f32 %v4374_v6, %v4654_v37  ;;  %4070 = vmatpush3.msra.mxu1 %v1255_v45  ;;  %4071 = vmatprep.mubr.msk.f32.mxu1 %vm4434_vm1, %v4431_v10  ;;  %v1517_v37 = vld [vmem:[%s5212_s2 + $0x18] sm:$0xff] }
 0x3e7   :  { %v843_v13 = vmul.f32 %v4376_v9, %v4656_v38  ;;  %4076 = vmatprep.mubr.msk.f32.mxu0 %vm4434_vm1, %v4431_v10  ;;  %4079 = vmatprep.subr.mxu1 %v4431_v10  ;;  %v4269_v39 = vpack.c.bf16 %v1517_v37, %v1516_v36 }
 0x3e8   :  { %v870_v14 = vmul.f32 0.25, %v862_v11  ;;  %854 = vst.msk [vmem:[%s5210_s8 + $0x30] sm:$0xff] %vm145_vm2, %v845_v12  ;;  %4077 = vmatmul.mubr.msk.f32.vlgmr.msra.gmra.mrb[12].mxu0 %vm145_vm2, %v845_v12  ;;  %v866_v22 = vsel %vm145_vm2, %v845_v12, 0.0  ;;  %4266 = vmatprep.subr.bf16.mxu0 %v4265_v34 }
 0x3e9   :  { %853 = vst.msk [vmem:[%s5210_s8 + $0x28] sm:$0xff] %vm145_vm2, %v843_v13  ;;  %v864_v16 = vsel %vm145_vm2, %v843_v13, 0.0  ;;  %4072 = vmatmul.mubr.msk.f32.vlgmr.msra.gmra.mrb[16].mxu1 %vm145_vm2, %v843_v13  ;;  %4268 = vmatpush3.bf16.msra.mxu0 %v4265_v34 }
 0x3ea   :  { %v4378_v20 = vpop.eup %4377  ;;  %872 = vst.msk [vmem:[%s5211_s9] sm:$0xff] %vm145_vm2, %v870_v14  ;;  %v865_v21 = vadd.f32 %v864_v16, %v863_v15  ;;  %4080 = vmatpush3.msra.mxu1 %v1407_v17  ;;  %4081 = vmatprep.mubr.msk.f32.mxu1 %vm4434_vm1, %v4431_v10  ;;  %v1645_v17 = vld [vmem:[%s5213_s3 + $0x8] sm:$0xff] }
 0x3eb   :  { %v847_v23 = vmul.f32 %v4378_v20, %v4662_v41  ;;  %4270 = vmatprep.subr.bf16.mxu0 %v4269_v39 }
 0x3ec   :  { %v867_v24 = vadd.f32 %v866_v22, %v865_v21  ;;  %v1646_v21 = vld [vmem:[%s5213_s3 + $0x10] sm:$0xff]  ;;  %v1647_v22 = vld [vmem:[%s5213_s3 + $0x18] sm:$0xff] }
 0x3ed   :  { %855 = vst.msk [vmem:[%s5210_s8 + $0x38] sm:$0xff] %vm145_vm2, %v847_v23  ;;  %v868_v25 = vsel %vm145_vm2, %v847_v23, 0.0  ;;  %4082 = vmatmul.mubr.msk.f32.vlgmr.msra.gmra.mrb[18].mxu1 %vm145_vm2, %v847_v23  ;;  %4272 = vmatpush3.bf16.msra.mxu0 %v4269_v39  ;;  %v4277_v23 = vpack.c.bf16 %v1647_v22, %v1646_v21 }
 0x3ee   :  { %v869_v26 = vadd.f32 %v868_v25, %v867_v24  ;;  %v1735_v24 = vld [vmem:[%s5214_s4] sm:$0xff]  ;;  %v1736_v25 = vld [vmem:[%s5214_s4 + $0x8] sm:$0xff] }
 0x3f0   :  { %v871_v27 = vmul.f32 0.25, %v869_v26  ;;  %v1737_v26 = vld [vmem:[%s5214_s4 + $0x10] sm:$0xff] }
 0x3f2   :  { %873 = vst.msk [vmem:[%s5211_s9 + $0x8] sm:$0xff] %vm145_vm2, %v871_v27  ;;  %v4281_v27 = vpack.c.bf16 %v1736_v25, %v1735_v24 }
 0x3f4   :  { %4282 = vmatprep.subr.bf16.mxu0 %v4281_v27 }
 0x45e   :  { %v946_v28 = vpop.f32.mrb[6].mxu0 }
 0x45f   :  { %v4048_v29 = vpop.f32.mrb[7].mxu0 }
 0x4af   :  { %v1022_v30 = vpop.f32.mrb[12].mxu1 }
 0x4b0   :  { %1484 = vrot.lane.b32.xlu0 %v1022_v30, %s4438_s13  ;;  %v4053_v33 = vpop.f32.mrb[13].mxu1  ;;  %v1739_v30 = vld [vmem:[%s5214_s4 + $0x20] sm:$0xff] }
 0x4b1   :  { %v4289_v32 = vpack.c.bf16 %v1740_v31, %v1739_v30 }
 0x4b3   :  { %v1098_v35 = vpop.f32.mrb[8].mxu0 }
 0x4b4   :  { %v4058_v38 = vpop.f32.mrb[9].mxu0  ;;  %1492 = vrot.lane.b32.xlu0 %v1098_v35, %s4439_s18 }
 0x4b7   :  { %v1250_v40 = vpop.f32.mrb[10].mxu0 }
 0x4b8   :  { %v1174_v41 = vpop.f32.mrb[14].mxu1  ;;  %v4068_v42 = vpop.f32.mrb[11].mxu0 }
 0x4b9   :  { %1500 = vrot.lane.b32.xlu0 %v1174_v41, %s4440_s19  ;;  %v4063_v43 = vpop.f32.mrb[15].mxu1  ;;  %v3792_v42 = vld [vmem:[%s5209_s5 + $0x5] ss:$0 sm:$0xff] }
 0x4bb   :  { %v1402_v44 = vpop.f32.mrb[12].mxu0 }
 0x4bc   :  { %v1326_v45 = vpop.f32.mrb[16].mxu1  ;;  %v4078_v46 = vpop.f32.mrb[13].mxu0 }
 0x4bd   :  { %1486 = vrot.lane.b32.xlu1 %v1326_v45, %s4438_s13  ;;  %v4073_v47 = vpop.f32.mrb[17].mxu1 }
 0x4c0   :  { %v1478_v48 = vpop.f32.mrb[18].mxu1 }
 0x4c1   :  { %v4083_v18 = vpop.f32.mrb[19].mxu1  ;;  %1494 = vrot.lane.b32.xlu1 %v1402_v44, %s4439_s18 }
 0x4c2   :  { %v1741_v18 = vld [vmem:[%s5214_s4 + $0x30] sm:$0xff] }
 0x4c5   :  { %1502 = vrot.lane.b32.xlu1 %v1478_v48, %s4440_s19 }
 0x522   :  { %v1485_v19 = vpop.permute.xlu0 %1484 }
 0x523   :  { %v1506_v50 = vsel %vm145_vm2, %v946_v28, %v1485_v19  ;;  %v1738_v28 = vld [vmem:[%s5214_s4 + $0x18] sm:$0xff] }
 0x524   :  { %v4285_v29 = vpack.c.bf16 %v1738_v28, %v1737_v26  ;;  %v1742_v19 = vld [vmem:[%s5214_s4 + $0x38] sm:$0xff]  ;;  %v3799_v28 = vld [vmem:[%s5209_s5 + $0x6] ss:$0 sm:$0xff] }
 0x526   :  { %v1493_v49 = vpop.permute.xlu0 %1492 }
 0x527   :  { %v1509_v51 = vsel %vm1508_vm3, %v1506_v50, %v1493_v49  ;;  %v4293_v49 = vpack.c.bf16 %v1742_v19, %v1741_v18  ;;  %v3793_v50 = vld [vmem:[%s5209_s5 + $0x2] ss:$0 sm:$0xff] }
 0x52b   :  { %v1501_v52 = vpop.permute.xlu0 %1500 }
 0x52c   :  { %v1512_v53 = vsel %vm1511_vm4, %v1509_v51, %v1501_v52 }
 0x52d   :  { %4092 = vmatprep.mubr.msk.f32.mxu0 %vm47_vm0, %v1512_v53 }
 0x52f   :  { %v1487_v54 = vpop.permute.xlu1 %1486 }
 0x530   :  { %v1507_v56 = vsel %vm145_vm2, %v1250_v40, %v1487_v54  ;;  %v3791_v40 = vld [vmem:[%s5209_s5 + $0x4] ss:$0 sm:$0xff] }
 0x533   :  { %v1495_v55 = vpop.permute.xlu1 %1494 }
 0x534   :  { %v1510_v57 = vsel %vm1508_vm3, %v1507_v56, %v1495_v55 }
 0x537   :  { %v1503_v58 = vpop.permute.xlu1 %1502 }
 0x538   :  { %v1513_v59 = vsel %vm1511_vm4, %v1510_v57, %v1503_v58  ;;  %v3796_v57 = vld [vmem:[%s5209_s5 + $0x3] ss:$0 sm:$0xff] }
 0x539   :  { %4093 = vmatmul.mubr.msk.f32.vlgmr.msra.gmra.mrb[14].mxu0 %vm47_vm0, %v1513_v59 }
 0x53a   :  { %4284 = vmatpush3.bf16.msra.mxu0 %v4281_v27 }
 0x53b   :  { %4286 = vmatprep.subr.bf16.mxu0 %v4285_v29 }
 0x53e   :  { %4288 = vmatpush3.bf16.msra.mxu0 %v4285_v29 }
 0x53f   :  { %4290 = vmatprep.subr.bf16.mxu0 %v4289_v32 }
 0x542   :  { %4292 = vmatpush3.bf16.msra.mxu0 %v4289_v32  ;;  %v3800_v32 = vld [vmem:[%s5209_s5 + $0x7] ss:$0 sm:$0xff] }
 0x543   :  { %4294 = vmatprep.subr.bf16.mxu0 %v4293_v49 }
 0x546   :  { %4296 = vmatpush3.bf16.msra.mxu0 %v4293_v49 }
 0x547   :  { %4146 = vmatprep.subr.mxu0 %v4431_v10 }
 0x60c   :  { %v4094_v61 = vpop.f32.mrb[14].mxu0 }
 0x60d   :  { %v1600_v62 = vadd.f32 %v4094_v61, %v3788_v60  ;;  %v1594_v63 = vpop.f32.mrb[15].mxu0 }
 0x60e   :  { %v1595_v0 = vadd.f32 %v3788_v60, %v1594_v63 }
 0x60f   :  { %v1604_v1 = vadd.f32 %v1600_v62, %v4513_v7 }
 0x610   :  { %v1603_v2 = vadd.f32 %v1595_v0, %v4506_v5  ;;  %v1644_v5 = vld [vmem:[%s5213_s3] sm:$0xff] }
 0x611   :  { %v1608_v3 = vsel %vm47_vm0, %v1604_v1, 0.0  ;;  %v4273_v20 = vpack.c.bf16 %v1645_v17, %v1644_v5  ;;  %v3803_v5 = vld [vmem:[%s5207_s1 + $0x30] sm:$0xff]  ;;  %v3804_v17 = vld [vmem:[%s5207_s1 + $0x38] sm:$0xff] }
 0x612   :  { %1609 = vadd.xlane.f32.xlu1 %v1608_v3  ;;  %v1605_v4 = vsel %vm47_vm0, %v1603_v2, 0.0 }
 0x613   :  { %1606 = vadd.xlane.f32.xlu0 %v1605_v4  ;;  %4274 = vmatprep.subr.bf16.mxu1 %v4273_v20 }
 0x614   :  { %4276 = vmatpush3.bf16.msra.mxu1 %v4273_v20  ;;  %v4301_v20 = vpack.c.bf16 %v3804_v17, %v3803_v5 }
 0x615   :  { %4278 = vmatprep.subr.bf16.mxu1 %v4277_v23 }
 0x618   :  { %4280 = vmatpush3.bf16.msra.mxu1 %v4277_v23 }
 0x69f   :  { %v1610_v6 = vpop.xlane.xlu1 %1609 }
 0x6a0   :  { %v1613_v8 = vmul.f32 0.03125, %v1610_v6  ;;  %v1607_v9 = vpop.xlane.xlu0 %1606 }
 0x6a1   :  { %v1612_v11 = vmul.f32 0.03125, %v1607_v9 }
 0x6a2   :  { %v1615_v12 = vsub.f32 %v1604_v1, %v1613_v8 }
 0x6a3   :  { %v1614_v13 = vsub.f32 %v1603_v2, %v1612_v11 }
 0x6a4   :  { %v1617_v16 = vmul.f32 %v1615_v12, %v1615_v12 }
 0x6a5   :  { %v1616_v14 = vmul.f32 %v1614_v13, %v1614_v13 }
 0x6a6   :  { %v1621_v7 = vsel %vm47_vm0, %v1617_v16, 0.0  ;;  %v3802_v16 = vld [vmem:[%s5207_s1 + $0x28] sm:$0xff] }
 0x6a7   :  { %v1618_v15 = vsel %vm47_vm0, %v1616_v14, 0.0 }
 0x6a8   :  { %1619 = vadd.xlane.f32.xlu0 %v1618_v15  ;;  %v3801_v15 = vld [vmem:[%s5207_s1 + $0x20] sm:$0xff] }
 0x6ac   :  { %1622 = vadd.xlane.f32.xlu0 %v1621_v7  ;;  %v4297_v7 = vpack.c.bf16 %v3802_v16, %v3801_v15 }
 0x6ae   :  { %4298 = vmatprep.subr.bf16.mxu1 %v4297_v7 }
 0x735   :  { %v1620_v33 = vpop.xlane.xlu0 %1619 }
 0x736   :  { %v1624_v34 = vmul.f32 0.03125, %v1620_v33 }
 0x738   :  { %v1626_v35 = vadd.f32 1e-05, %v1624_v34 }
 0x739   :  { %v1623_v36 = vpop.xlane.xlu0 %1622 }
 0x73a   :  { %4379 = vrsqrt.f32 %v1626_v35  ;;  %v1625_v37 = vmul.f32 0.03125, %v1623_v36 }
 0x73c   :  { %v1627_v38 = vadd.f32 1e-05, %v1625_v37  ;;  %v3805_v37 = vld [vmem:[%s5209_s5 + $0x8] ss:$0 sm:$0xff] }
 0x73e   :  { %4381 = vrsqrt.f32 %v1627_v38 }
 0x744   :  { %v4380_v39 = vpop.eup %4379 }
 0x745   :  { %v1630_v41 = vmul.f32 %v4380_v39, %v1614_v13 }
 0x747   :  { %v1636_v43 = vmul.f32 %v3791_v40, %v1630_v41 }
 0x748   :  { %v4382_v44 = vpop.eup %4381 }
 0x749   :  { %v1631_v45 = vmul.f32 %v4382_v44, %v1615_v12  ;;  %v1642_v46 = vadd.f32 %v3792_v42, %v1636_v43 }
 0x74b   :  { %v1637_v47 = vmul.f32 %v3791_v40, %v1631_v45  ;;  %4103 = vmatprep.mubr.msk.f32.mxu1 %vm47_vm0, %v1642_v46 }
 0x74d   :  { %v1643_v48 = vadd.f32 %v3792_v42, %v1637_v47 }
 0x74f   :  { %4104 = vmatmul.mubr.msk.f32.vlgmr.msra.gmra.mrb[20].mxu1 %vm47_vm0, %v1643_v48 }
 0x750   :  { %4300 = vmatpush3.bf16.msra.mxu1 %v4297_v7 }
 0x751   :  { %4302 = vmatprep.subr.bf16.mxu1 %v4301_v20 }
 0x754   :  { %4304 = vmatpush3.bf16.msra.mxu1 %v4301_v20 }
 0x755   :  { %4136 = vmatprep.subr.mxu1 %v4431_v10 }
 0x822   :  { %v4105_v51 = vpop.f32.mrb[20].mxu1 }
 0x823   :  { %v1730_v52 = vadd.f32 %v4105_v51, %v3793_v50  ;;  %v1724_v53 = vpop.f32.mrb[21].mxu1 }
 0x824   :  { %v1725_v54 = vadd.f32 %v3793_v50, %v1724_v53 }
 0x825   :  { %v1734_v56 = vmax.f32 %v1730_v52, 0.0 }
 0x826   :  { %v1733_v55 = vmax.f32 %v1725_v54, 0.0 }
 0x828   :  { %4122 = vmatprep.mubr.msk.f32.mxu0 %vm1747_vm5, %v1733_v55 }
 0x829   :  { %4123 = vmatmul.mubr.msk.f32.vlgmr.msra.gmra.mrb[16].mxu0 %vm1747_vm5, %v1734_v56 }
 0x82a   :  { %4148 = vmatprep.mubr.msk.f32.mxu0 %vm4434_vm1, %v4431_v10 }
 0x8fc   :  { %v4124_v58 = vpop.f32.mrb[16].mxu0 }
 0x8fd   :  { %v1826_v59 = vadd.f32 %v4124_v58, %v3796_v57  ;;  %v1820_v60 = vpop.f32.mrb[17].mxu0 }
 0x8fe   :  { %v1821_v61 = vadd.f32 %v3796_v57, %v1820_v60 }
 0x8ff   :  { %v1830_v62 = vadd.f32 %v1826_v59, %v1643_v48 }
 0x900   :  { %v1829_v63 = vadd.f32 %v1821_v61, %v1642_v46 }
 0x901   :  { %v1834_v0 = vsel %vm47_vm0, %v1830_v62, 0.0 }
 0x902   :  { %1835 = vadd.xlane.f32.xlu0 %v1834_v0  ;;  %v1831_v1 = vsel %vm47_vm0, %v1829_v63, 0.0 }
 0x903   :  { %1832 = vadd.xlane.f32.xlu1 %v1831_v1 }
 0x98f   :  { %v1836_v2 = vpop.xlane.xlu0 %1835 }
 0x990   :  { %v1838_v3 = vmul.f32 0.03125, %v1836_v2  ;;  %v1833_v4 = vpop.xlane.xlu1 %1832 }
 0x991   :  { %v1837_v6 = vmul.f32 0.03125, %v1833_v4 }
 0x992   :  { %v1840_v8 = vsub.f32 %v1830_v62, %v1838_v3 }
 0x993   :  { %v1839_v9 = vsub.f32 %v1829_v63, %v1837_v6 }
 0x994   :  { %v1842_v11 = vmul.f32 %v1840_v8, %v1840_v8 }
 0x995   :  { %v1841_v12 = vmul.f32 %v1839_v9, %v1839_v9 }
 0x996   :  { %v1846_v13 = vsel %vm47_vm0, %v1842_v11, 0.0 }
 0x997   :  { %1847 = vadd.xlane.f32.xlu0 %v1846_v13  ;;  %v1843_v14 = vsel %vm47_vm0, %v1841_v12, 0.0 }
 0x998   :  { %1844 = vadd.xlane.f32.xlu1 %v1843_v14 }
 0xa24   :  { %v1848_v21 = vpop.xlane.xlu0 %1847 }
 0xa25   :  { %v1850_v22 = vmul.f32 0.03125, %v1848_v21  ;;  %v1845_v23 = vpop.xlane.xlu1 %1844 }
 0xa26   :  { %v1849_v24 = vmul.f32 0.03125, %v1845_v23 }
 0xa27   :  { %v1852_v25 = vadd.f32 1e-05, %v1850_v22 }
 0xa28   :  { %v1851_v26 = vadd.f32 1e-05, %v1849_v24 }
 0xa29   :  { %4383 = vrsqrt.f32 %v1852_v25 }
 0xa2a   :  { %4385 = vrsqrt.f32 %v1851_v26 }
 0xa33   :  { %v4384_v27 = vpop.eup %4383 }
 0xa34   :  { %v4386_v29 = vpop.eup %4385  ;;  %v1856_v30 = vmul.f32 %v4384_v27, %v1840_v8 }
 0xa35   :  { %v1855_v31 = vmul.f32 %v4386_v29, %v1839_v9 }
 0xa36   :  { %v1862_v33 = vmul.f32 %v3799_v28, %v1856_v30 }
 0xa37   :  { %v1861_v34 = vmul.f32 %v3799_v28, %v1855_v31 }
 0xa38   :  { %v4863_v36 = vadd.f32 %v3800_v32, %v1862_v33 }
 0xa39   :  { %v4861_v35 = vadd.f32 %v3800_v32, %v1861_v34 }
 0xa3b   :  { %4133 = vmatprep.mubr.msk.f32.mxu1 %vm47_vm0, %v4861_v35 }
 0xa3c   :  { %4134 = vmatmul.mubr.msk.f32.vlgmr.msra.gmra.mrb[22].mxu1 %vm47_vm0, %v4863_v36 }
 0xa3d   :  { %4138 = vmatprep.mubr.msk.f32.mxu1 %vm4434_vm1, %v4431_v10 }
 0xb0f   :  { %v4135_v38 = vpop.f32.mrb[22].mxu1 }
 0xb10   :  { %v1958_v39 = vpop.f32.mrb[23].mxu1  ;;  %v4880_v41 = vadd.f32 %v4135_v38, %v3805_v37 }
 0xb11   :  { %v4874_v40 = vadd.f32 %v3805_v37, %v1958_v39 }
 0xb13   :  { %1973 = vrot.lane.b32.xlu0 %v4874_v40, %s4435_s24  ;;  %1969 = vrot.lane.b32.xlu1 %v4874_v40, %s4433_s0 }
 0xb17   :  { %1975 = vrot.lane.b32.xlu0 %v4880_v41, %s4435_s24  ;;  %1977 = vrot.lane.b32.xlu1 %v4874_v40, %s4432_s23 }
 0xb1b   :  { %1981 = vrot.lane.b32.xlu0 %v4874_v40, %s4436_s25  ;;  %1971 = vrot.lane.b32.xlu1 %v4880_v41, %s4433_s0 }
 0xb1f   :  { %1979 = vrot.lane.b32.xlu1 %v4880_v41, %s4432_s23 }
 0xb85   :  { %v4892_v42 = vpop.permute.xlu0 %1973  ;;  %v4894_v43 = vpop.permute.xlu1 %1969 }
 0xb86   :  { %2133 = vrot.lane.b32.xlu0 %v4892_v42, %s4436_s25  ;;  %2057 = vrot.lane.b32.xlu1 %v4894_v43, %s4436_s25 }
 0xb89   :  { %v4900_v44 = vpop.permute.xlu0 %1975  ;;  %v4902_v45 = vpop.permute.xlu1 %1977 }
 0xb8a   :  { %2285 = vrot.lane.b32.xlu0 %v4880_v41, %s4436_s25  ;;  %2209 = vrot.lane.b32.xlu1 %v4902_v45, %s4436_s25 }
 0xb8d   :  { %v1982_v46 = vpop.permute.xlu0 %1981  ;;  %v4908_v47 = vpop.permute.xlu1 %1971 }
 0xb8e   :  { %2437 = vrot.lane.b32.xlu0 %v4900_v44, %s4436_s25  ;;  %4137 = vmatpush3.xpose.msk.msra.mxu1 %vm145_vm2, %v1982_v46 }
 0xb8f   :  { %2361 = vrot.lane.b32.xlu1 %v4908_v47, %s4436_s25  ;;  %4141 = vmatprep.subr.mxu1 %v4431_v10 }
 0xb91   :  { %4139 = vmatmul.mubr.msk.f32.vlgmr.msra.gmra.mrb[24].mxu1 %vm145_vm2, %v4874_v40  ;;  %v4918_v48 = vpop.permute.xlu1 %1979 }
 0xb92   :  { %4143 = vmatprep.mubr.msk.f32.mxu1 %vm4434_vm1, %v4431_v10 }
 0xb93   :  { %2513 = vrot.lane.b32.xlu1 %v4918_v48, %s4436_s25 }
 0xbf8   :  { %v2134_v18 = vpop.permute.xlu0 %2133  ;;  %v2058_v19 = vpop.permute.xlu1 %2057 }
 0xbf9   :  { %4142 = vmatpush3.xpose.msk.msra.mxu1 %vm145_vm2, %v2058_v19  ;;  %4147 = vmatpush3.xpose.msk.msra.mxu0 %vm145_vm2, %v2134_v18 }
 0xbfa   :  { %4156 = vmatprep.subr.mxu0 %v4431_v10  ;;  %4151 = vmatprep.subr.mxu1 %v4431_v10 }
 0xbfc   :  { %4149 = vmatmul.mubr.msk.f32.vlgmr.msra.gmra.mrb[18].mxu0 %vm145_vm2, %v4892_v42  ;;  %v2286_v49 = vpop.permute.xlu0 %2285  ;;  %4144 = vmatmul.mubr.msk.f32.vlgmr.msra.gmra.mrb[26].mxu1 %vm145_vm2, %v4894_v43  ;;  %v2210_v50 = vpop.permute.xlu1 %2209 }
 0xbfd   :  { %4152 = vmatpush3.xpose.msk.msra.mxu1 %vm145_vm2, %v2210_v50  ;;  %4157 = vmatpush3.xpose.msk.msra.mxu0 %vm145_vm2, %v2286_v49 }
 0xbfe   :  { %4153 = vmatprep.mubr.msk.f32.mxu1 %vm4434_vm1, %v4431_v10  ;;  %4158 = vmatprep.mubr.msk.f32.mxu0 %vm4434_vm1, %v4431_v10 }
 0xbff   :  { %4166 = vmatprep.subr.mxu0 %v4431_v10  ;;  %4161 = vmatprep.subr.mxu1 %v4431_v10 }
 0xc00   :  { %4159 = vmatmul.mubr.msk.f32.vlgmr.msra.gmra.mrb[20].mxu0 %vm145_vm2, %v4880_v41  ;;  %v2438_v51 = vpop.permute.xlu0 %2437  ;;  %4154 = vmatmul.mubr.msk.f32.vlgmr.msra.gmra.mrb[28].mxu1 %vm145_vm2, %v4902_v45 }
 0xc01   :  { %v2362_v52 = vpop.permute.xlu1 %2361  ;;  %4167 = vmatpush3.xpose.msk.msra.mxu0 %vm145_vm2, %v2438_v51  ;;  %4163 = vmatprep.mubr.msk.f32.mxu1 %vm4434_vm1, %v4431_v10 }
 0xc02   :  { %4162 = vmatpush3.xpose.msk.msra.mxu1 %vm145_vm2, %v2362_v52  ;;  %4168 = vmatprep.mubr.msk.f32.mxu0 %vm4434_vm1, %v4431_v10 }
 0xc03   :  { %4171 = vmatprep.subr.mxu1 %v4431_v10  ;;  %4176 = vmatprep.subr.mxu0 %v4431_v10 }
 0xc04   :  { %4169 = vmatmul.mubr.msk.f32.vlgmr.msra.gmra.mrb[22].mxu0 %vm145_vm2, %v4900_v44 }
 0xc05   :  { %4164 = vmatmul.mubr.msk.f32.vlgmr.msra.gmra.mrb[30].mxu1 %vm145_vm2, %v4908_v47  ;;  %v2514_v53 = vpop.permute.xlu1 %2513  ;;  %4178 = vmatprep.mubr.msk.f32.mxu0 %vm4434_vm1, %v4431_v10 }
 0xc06   :  { %4172 = vmatpush3.xpose.msk.msra.mxu1 %vm145_vm2, %v2514_v53  ;;  %4173 = vmatprep.mubr.msk.f32.mxu1 %vm4434_vm1, %v4431_v10 }
 0xc07   :  { %4181 = vmatprep.subr.mxu1 %v4431_v10 }
 0xc09   :  { %4174 = vmatmul.mubr.msk.f32.vlgmr.msra.gmra.mrb[32].mxu1 %vm145_vm2, %v4918_v48 }
 0xc0a   :  { %4183 = vmatprep.mubr.msk.f32.mxu1 %vm4434_vm1, %v4431_v10 }
 0xc64   :  { %v2053_v54 = vpop.f32.mrb[24].mxu1 }
 0xc65   :  { %v2589_v55 = vmul.f32 0.35355338, %v2053_v54  ;;  %v4140_v56 = vpop.f32.mrb[25].mxu1 }
 0xc67   :  { %v2597_v57 = vsel %vm145_vm2, %v2589_v55, -inf }
 0xc68   :  { %2598 = vmax.xlane.f32.xlu0 %v2597_v57 }
 0xccf   :  { %v2129_v58 = vpop.f32.mrb[26].mxu1  ;;  %v2205_v59 = vpop.f32.mrb[18].mxu0 }
 0xcd0   :  { %v2590_v60 = vmul.f32 0.35355338, %v2129_v58  ;;  %v2591_v61 = vmul.f32 0.35355338, %v2205_v59  ;;  %v4145_v62 = vpop.f32.mrb[27].mxu1  ;;  %v4150_v63 = vpop.f32.mrb[19].mxu0 }
 0xcd2   :  { %v2603_v0 = vsel %vm145_vm2, %v2591_v61, -inf  ;;  %v2600_v1 = vsel %vm145_vm2, %v2590_v60, -inf }
 0xcd3   :  { %2604 = vmax.xlane.f32.xlu0 %v2603_v0  ;;  %v2357_v2 = vpop.f32.mrb[20].mxu0  ;;  %2601 = vmax.xlane.f32.xlu1 %v2600_v1  ;;  %v2281_v3 = vpop.f32.mrb[28].mxu1 }
 0xcd4   :  { %v2593_v4 = vmul.f32 0.35355338, %v2357_v2  ;;  %v2592_v6 = vmul.f32 0.35355338, %v2281_v3  ;;  %v4155_v8 = vpop.f32.mrb[29].mxu1  ;;  %v4160_v9 = vpop.f32.mrb[21].mxu0 }
 0xcd6   :  { %v2609_v11 = vsel %vm145_vm2, %v2593_v4, -inf  ;;  %v2606_v12 = vsel %vm145_vm2, %v2592_v6, -inf }
 0xcd7   :  { %v2509_v13 = vpop.f32.mrb[22].mxu0  ;;  %2610 = vmax.xlane.f32.xlu1 %v2609_v11  ;;  %2607 = vmax.xlane.f32.xlu0 %v2606_v12 }
 0xcd8   :  { %v2595_v14 = vmul.f32 0.35355338, %v2509_v13  ;;  %v2433_v15 = vpop.f32.mrb[30].mxu1  ;;  %v4170_v16 = vpop.f32.mrb[23].mxu0 }
 0xcd9   :  { %v2594_v7 = vmul.f32 0.35355338, %v2433_v15  ;;  %v4165_v5 = vpop.f32.mrb[31].mxu1 }
 0xcda   :  { %v2615_v17 = vsel %vm145_vm2, %v2595_v14, -inf }
 0xcdb   :  { %2616 = vmax.xlane.f32.xlu1 %v2615_v17  ;;  %v2612_v20 = vsel %vm145_vm2, %v2594_v7, -inf }
 0xcdc   :  { %2613 = vmax.xlane.f32.xlu0 %v2612_v20  ;;  %v2585_v21 = vpop.f32.mrb[32].mxu1 }
 0xcdd   :  { %v2596_v22 = vmul.f32 0.35355338, %v2585_v21  ;;  %v4175_v23 = vpop.f32.mrb[33].mxu1 }
 0xcdf   :  { %v2618_v24 = vsel %vm145_vm2, %v2596_v22, -inf }
 0xce0   :  { %2619 = vmax.xlane.f32.xlu0 %v2618_v24 }
 0xcec   :  { %2713 = vrot.lane.b32.xlu1 %v4874_v40, %s4437_s26 }
 0xcf0   :  { %2865 = vrot.lane.b32.xlu1 %v4892_v42, %s4437_s26 }
 0xcf4   :  { %2941 = vrot.lane.b32.xlu1 %v4902_v45, %s4437_s26 }
 0xcf5   :  { %v2599_v25 = vpop.xlane.xlu0 %2598 }
 0xcf6   :  { %2789 = vrot.lane.b32.xlu0 %v4894_v43, %s4437_s26  ;;  %v2621_v26 = vsub.f32 %v2589_v55, %v2599_v25 }
 0xcf8   :  { %3093 = vrot.lane.b32.xlu1 %v4908_v47, %s4437_s26  ;;  %v2629_v27 = vmul.f32 1.442695, %v2621_v26 }
 0xcfa   :  { %3017 = vrot.lane.b32.xlu0 %v4880_v41, %s4437_s26  ;;  %4387 = vpow2.f32 %v2629_v27 }
 0xd04   :  { %v4986_v28 = vpop.eup %4387 }
 0xd05   :  { %v2645_v29 = vsel %vm145_vm2, %v4986_v28, 0.0 }
 0xd1c   :  { %2646 = vadd.xlane.f32.xlu1 %v2645_v29 }
 0xd60   :  { %v2605_v30 = vpop.xlane.xlu0 %2604  ;;  %v2602_v31 = vpop.xlane.xlu1 %2601 }
 0xd61   :  { %v2623_v32 = vsub.f32 %v2591_v61, %v2605_v30  ;;  %v2622_v33 = vsub.f32 %v2590_v60, %v2602_v31 }
 0xd63   :  { %v2633_v34 = vmul.f32 1.442695, %v2623_v32  ;;  %v2631_v37 = vmul.f32 1.442695, %v2622_v33 }
 0xd64   :  { %v2608_v38 = vpop.xlane.xlu0 %2607  ;;  %v2611_v39 = vpop.xlane.xlu1 %2610 }
 0xd65   :  { %4389 = vpow2.f32 %v2633_v34  ;;  %v2624_v40 = vsub.f32 %v2592_v6, %v2608_v38  ;;  %v2625_v41 = vsub.f32 %v2593_v4, %v2611_v39 }
 0xd66   :  { %4391 = vpow2.f32 %v2631_v37 }
 0xd67   :  { %v2635_v42 = vmul.f32 1.442695, %v2624_v40  ;;  %v2637_v43 = vmul.f32 1.442695, %v2625_v41 }
 0xd68   :  { %v2617_v45 = vpop.xlane.xlu1 %2616 }
 0xd69   :  { %4393 = vpow2.f32 %v2635_v42  ;;  %v2614_v46 = vpop.xlane.xlu0 %2613  ;;  %v2627_v47 = vsub.f32 %v2595_v14, %v2617_v45 }
 0xd6a   :  { %4395 = vpow2.f32 %v2637_v43  ;;  %v2626_v18 = vsub.f32 %v2594_v7, %v2614_v46 }
 0xd6b   :  { %v2641_v19 = vmul.f32 1.442695, %v2627_v47 }
 0xd6c   :  { %v2639_v49 = vmul.f32 1.442695, %v2626_v18  ;;  %v2714_v50 = vpop.permute.xlu1 %2713 }
 0xd6d   :  { %4397 = vpow2.f32 %v2641_v19  ;;  %v2620_v51 = vpop.xlane.xlu0 %2619  ;;  %4177 = vmatpush3.msra.mxu0 %v2714_v50 }
 0xd6e   :  { %4399 = vpow2.f32 %v2639_v49  ;;  %v2628_v52 = vsub.f32 %v2596_v22, %v2620_v51  ;;  %4186 = vmatprep.subr.mxu0 %v4431_v10 }
 0xd6f   :  { %v4390_v53 = vpop.eup %4389 }
 0xd70   :  { %v4392_v54 = vpop.eup %4391  ;;  %v2643_v55 = vmul.f32 1.442695, %v2628_v52  ;;  %v2651_v56 = vsel %vm145_vm2, %v4390_v53, 0.0  ;;  %v2866_v6 = vpop.permute.xlu1 %2865 }
 0xd71   :  { %v2790_v57 = vpop.permute.xlu0 %2789  ;;  %2652 = vadd.xlane.f32.xlu1 %v2651_v56  ;;  %v2648_v58 = vsel %vm145_vm2, %v4392_v54, 0.0  ;;  %v3843_v56 = vld [vmem:[%s5212_s2 + $0x28] sm:$0xff] }
 0xd72   :  { %4401 = vpow2.f32 %v2643_v55  ;;  %4182 = vmatpush3.msra.mxu1 %v2790_v57  ;;  %2649 = vadd.xlane.f32.xlu0 %v2648_v58 }
 0xd73   :  { %v4394_v59 = vpop.eup %4393  ;;  %4191 = vmatprep.subr.mxu1 %v4431_v10 }
 0xd74   :  { %v4994_v60 = vpop.eup %4395  ;;  %v2654_v61 = vsel %vm145_vm2, %v4394_v59, 0.0  ;;  %v2942_v8 = vpop.permute.xlu1 %2941 }
 0xd75   :  { %v2657_v62 = vsel %vm145_vm2, %v4994_v60, 0.0 }
 0xd76   :  { %2655 = vadd.xlane.f32.xlu0 %v2654_v61  ;;  %2658 = vadd.xlane.f32.xlu1 %v2657_v62  ;;  %v3844_v61 = vld [vmem:[%s5212_s2 + $0x30] sm:$0xff]  ;;  %v3845_v62 = vld [vmem:[%s5212_s2 + $0x38] sm:$0xff] }
 0xd77   :  { %v4999_v63 = vpop.eup %4397 }
 0xd78   :  { %v5001_v0 = vpop.eup %4399  ;;  %v2663_v1 = vsel %vm145_vm2, %v4999_v63, 0.0  ;;  %v3094_v9 = vpop.permute.xlu1 %3093 }
 0xd79   :  { %v2660_v2 = vsel %vm145_vm2, %v5001_v0, 0.0 }
 0xd7a   :  { %2661 = vadd.xlane.f32.xlu0 %v2660_v2  ;;  %2664 = vadd.xlane.f32.xlu1 %v2663_v1 }
 0xd7c   :  { %v5007_v3 = vpop.eup %4401 }
 0xd7d   :  { %v2666_v4 = vsel %vm145_vm2, %v5007_v3, 0.0 }
 0xd7e   :  { %2667 = vadd.xlane.f32.xlu0 %v2666_v4 }
 0xd8b   :  { %3245 = vrot.lane.b32.xlu1 %v4918_v48, %s4437_s26 }
 0xd94   :  { %3169 = vrot.lane.b32.xlu0 %v4900_v44, %s4437_s26  ;;  %v3018_v44 = vpop.permute.xlu0 %3017 }
 0xda9   :  { %v2647_v11 = vpop.xlane.xlu1 %2646 }
 0xdaa   :  { %4403 = vrcp.f32 %v2647_v11 }
 0xdb4   :  { %v4404_v12 = vpop.eup %4403 }
 0xdb5   :  { %v2670_v13 = vmul.f32 %v4404_v12, %v4986_v28 }
 0xdb7   :  { %3824 = vst.msk [vmem:[%s5210_s8 + $0x40] sm:$0xff] %vm145_vm2, %v2670_v13  ;;  %4179 = vmatmul.mubr.msk.f32.vlgmr.msra.gmra.mrb[24].mxu0 %vm145_vm2, %v2670_v13  ;;  %v2694_v24 = vsel %vm145_vm2, %v2670_v13, 0.0 }
 0xdb8   :  { %4187 = vmatpush3.msra.mxu0 %v2866_v6  ;;  %4188 = vmatprep.mubr.msk.f32.mxu0 %vm4434_vm1, %v4431_v10 }
 0xdb9   :  { %4196 = vmatprep.subr.mxu0 %v4431_v10 }
 0xdfe   :  { %v2653_v48 = vpop.xlane.xlu1 %2652 }
 0xdff   :  { %v2650_v14 = vpop.xlane.xlu0 %2649  ;;  %4405 = vrcp.f32 %v2653_v48 }
 0xe00   :  { %4407 = vrcp.f32 %v2650_v14 }
 0xe03   :  { %v2656_v15 = vpop.xlane.xlu0 %2655  ;;  %v2659_v16 = vpop.xlane.xlu1 %2658 }
 0xe04   :  { %4409 = vrcp.f32 %v2656_v15 }
 0xe05   :  { %4411 = vrcp.f32 %v2659_v16 }
 0xe07   :  { %v2662_v7 = vpop.xlane.xlu0 %2661  ;;  %v2665_v5 = vpop.xlane.xlu1 %2664 }
 0xe08   :  { %4413 = vrcp.f32 %v2662_v7 }
 0xe09   :  { %v4406_v17 = vpop.eup %4405  ;;  %4415 = vrcp.f32 %v2665_v5 }
 0xe0a   :  { %v4408_v20 = vpop.eup %4407  ;;  %v2674_v21 = vmul.f32 %v4406_v17, %v4390_v53 }
 0xe0b   :  { %v2672_v22 = vmul.f32 %v4408_v20, %v4392_v54  ;;  %v2668_v23 = vpop.xlane.xlu0 %2667  ;;  %v3246_v46 = vpop.permute.xlu1 %3245 }
 0xe0c   :  { %3826 = vst.msk [vmem:[%s5210_s8 + $0x50] sm:$0xff] %vm145_vm2, %v2674_v21  ;;  %4417 = vrcp.f32 %v2668_v23  ;;  %4189 = vmatmul.mubr.msk.f32.vlgmr.msra.gmra.mrb[26].mxu0 %vm145_vm2, %v2674_v21  ;;  %v2697_v29 = vsel %vm145_vm2, %v2674_v21, 0.0 }
 0xe0d   :  { %3825 = vst.msk [vmem:[%s5210_s8 + $0x48] sm:$0xff] %vm145_vm2, %v2672_v22  ;;  %v2695_v25 = vsel %vm145_vm2, %v2672_v22, 0.0  ;;  %4184 = vmatmul.mubr.msk.f32.vlgmr.msra.gmra.mrb[34].mxu1 %vm145_vm2, %v2672_v22  ;;  %4197 = vmatpush3.msra.mxu0 %v3018_v44 }
 0xe0e   :  { %v4410_v26 = vpop.eup %4409  ;;  %v2696_v27 = vadd.f32 %v2695_v25, %v2694_v24  ;;  %4192 = vmatpush3.msra.mxu1 %v2942_v8  ;;  %4193 = vmatprep.mubr.msk.f32.mxu1 %vm4434_vm1, %v4431_v10  ;;  %v3846_v24 = vld [vmem:[%s5209_s5 + $0x9] ss:$0 sm:$0xff] }
 0xe0f   :  { %v4412_v28 = vpop.eup %4411  ;;  %v2676_v30 = vmul.f32 %v4410_v26, %v4394_v59  ;;  %4198 = vmatprep.mubr.msk.f32.mxu0 %vm4434_vm1, %v4431_v10  ;;  %4201 = vmatprep.subr.mxu1 %v4431_v10  ;;  %v3170_v33 = vpop.permute.xlu0 %3169 }
 0xe10   :  { %v2698_v31 = vadd.f32 %v2697_v29, %v2696_v27  ;;  %v2678_v32 = vmul.f32 %v4412_v28, %v4994_v60  ;;  %4206 = vmatprep.subr.mxu0 %v4431_v10 }
 0xe11   :  { %3827 = vst.msk [vmem:[%s5210_s8 + $0x58] sm:$0xff] %vm145_vm2, %v2676_v30  ;;  %v2699_v34 = vsel %vm145_vm2, %v2676_v30, 0.0  ;;  %4194 = vmatmul.mubr.msk.f32.vlgmr.msra.gmra.mrb[36].mxu1 %vm145_vm2, %v2676_v30 }
 0xe12   :  { %v4414_v37 = vpop.eup %4413  ;;  %v2700_v38 = vadd.f32 %v2699_v34, %v2698_v31  ;;  %3828 = vst.msk [vmem:[%s5210_s8 + $0x60] sm:$0xff] %vm145_vm2, %v2678_v32  ;;  %4199 = vmatmul.mubr.msk.f32.vlgmr.msra.gmra.mrb[28].mxu0 %vm145_vm2, %v2678_v32  ;;  %4202 = vmatpush3.msra.mxu1 %v3094_v9  ;;  %v2701_v43 = vsel %vm145_vm2, %v2678_v32, 0.0 }
 0xe13   :  { %v4416_v39 = vpop.eup %4415  ;;  %v2680_v40 = vmul.f32 %v4414_v37, %v5001_v0  ;;  %4207 = vmatpush3.msra.mxu0 %v3170_v33  ;;  %4203 = vmatprep.mubr.msk.f32.mxu1 %vm4434_vm1, %v4431_v10  ;;  %v4309_v0 = vpack.c.bf16 %v3845_v62, %v3844_v61 }
 0xe14   :  { %v2708_v41 = vmul.f32 0.25, %v2700_v38  ;;  %v2682_v42 = vmul.f32 %v4416_v39, %v4999_v63  ;;  %4208 = vmatprep.mubr.msk.f32.mxu0 %vm4434_vm1, %v4431_v10  ;;  %4211 = vmatprep.subr.mxu1 %v4431_v10 }
 0xe15   :  { %3829 = vst.msk [vmem:[%s5210_s8 + $0x68] sm:$0xff] %vm145_vm2, %v2680_v40  ;;  %v2702_v45 = vsel %vm145_vm2, %v2680_v40, 0.0  ;;  %4204 = vmatmul.mubr.msk.f32.vlgmr.msra.gmra.mrb[38].mxu1 %vm145_vm2, %v2680_v40 }
 0xe16   :  { %v4418_v47 = vpop.eup %4417  ;;  %3832 = vst.msk [vmem:[%s5211_s9 + $0x10] sm:$0xff] %vm145_vm2, %v2708_v41  ;;  %v2703_v18 = vadd.f32 %v2702_v45, %v2701_v43  ;;  %3830 = vst.msk [vmem:[%s5210_s8 + $0x70] sm:$0xff] %vm145_vm2, %v2682_v42  ;;  %4209 = vmatmul.mubr.msk.f32.vlgmr.msra.gmra.mrb[30].mxu0 %vm145_vm2, %v2682_v42  ;;  %4212 = vmatpush3.msra.mxu1 %v3246_v46  ;;  %v2704_v19 = vsel %vm145_vm2, %v2682_v42, 0.0  ;;  %v3852_v45 = vld [vmem:[%s5213_s3 + $0x28] sm:$0xff] }
 0xe17   :  { %v2684_v49 = vmul.f32 %v4418_v47, %v5007_v3  ;;  %4213 = vmatprep.mubr.msk.f32.mxu1 %vm4434_vm1, %v4431_v10  ;;  %v3842_v10 = vld [vmem:[%s5212_s2 + $0x20] sm:$0xff]  ;;  %v3853_v47 = vld [vmem:[%s5213_s3 + $0x30] sm:$0xff] }
 0xe18   :  { %v2705_v50 = vadd.f32 %v2704_v19, %v2703_v18  ;;  %v4305_v57 = vpack.c.bf16 %v3843_v56, %v3842_v10  ;;  %v3854_v18 = vld [vmem:[%s5213_s3 + $0x38] sm:$0xff]  ;;  %v3863_v10 = vld [vmem:[%s5214_s4 + $0x68] sm:$0xff] }
 0xe19   :  { %3831 = vst.msk [vmem:[%s5210_s8 + $0x78] sm:$0xff] %vm145_vm2, %v2684_v49  ;;  %v2706_v51 = vsel %vm145_vm2, %v2684_v49, 0.0  ;;  %4214 = vmatmul.mubr.msk.f32.vlgmr.msra.gmra.mrb[40].mxu1 %vm145_vm2, %v2684_v49  ;;  %v4317_v19 = vpack.c.bf16 %v3854_v18, %v3853_v47  ;;  %v3858_v49 = vld [vmem:[%s5214_s4 + $0x40] sm:$0xff]  ;;  %v3869_v47 = vld [vmem:[%s5209_s5 + $0xe] ss:$0 sm:$0xff] }
 0xe1a   :  { %v2707_v52 = vadd.f32 %v2706_v51, %v2705_v50  ;;  %4306 = vmatprep.subr.bf16.mxu0 %v4305_v57  ;;  %v3859_v50 = vld [vmem:[%s5214_s4 + $0x48] sm:$0xff]  ;;  %v3860_v51 = vld [vmem:[%s5214_s4 + $0x50] sm:$0xff] }
 0xe1b   :  { %4308 = vmatpush3.bf16.msra.mxu0 %v4305_v57 }
 0xe1c   :  { %v2709_v53 = vmul.f32 0.25, %v2707_v52  ;;  %4310 = vmatprep.subr.bf16.mxu0 %v4309_v0  ;;  %v4321_v52 = vpack.c.bf16 %v3859_v50, %v3858_v49  ;;  %v3870_v49 = vld [vmem:[%s5209_s5 + $0xf] ss:$0 sm:$0xff] }
 0xe1e   :  { %3833 = vst.msk [vmem:[%s5211_s9 + $0x18] sm:$0xff] %vm145_vm2, %v2709_v53  ;;  %v3861_v53 = vld [vmem:[%s5214_s4 + $0x58] sm:$0xff] }
 0xe1f   :  { %4312 = vmatpush3.bf16.msra.mxu0 %v4309_v0  ;;  %v3849_v0 = vld [vmem:[%s5209_s5 + $0xc] ss:$0 sm:$0xff] }
 0xe20   :  { %4322 = vmatprep.subr.bf16.mxu0 %v4321_v52 }
 0xe8a   :  { %v2785_v54 = vpop.f32.mrb[24].mxu0 }
 0xe8b   :  { %v4180_v55 = vpop.f32.mrb[25].mxu0 }
 0xe8c   :  { %v3862_v55 = vld [vmem:[%s5214_s4 + $0x60] sm:$0xff] }
 0xe8d   :  { %v4329_v56 = vpack.c.bf16 %v3863_v10, %v3862_v55 }
 0xedf   :  { %v2937_v58 = vpop.f32.mrb[26].mxu0 }
 0xee0   :  { %v2861_v59 = vpop.f32.mrb[34].mxu1  ;;  %v4190_v60 = vpop.f32.mrb[27].mxu0 }
 0xee1   :  { %3323 = vrot.lane.b32.xlu0 %v2861_v59, %s4438_s13  ;;  %v4185_v63 = vpop.f32.mrb[35].mxu1 }
 0xee4   :  { %v3013_v1 = vpop.f32.mrb[36].mxu1 }
 0xee5   :  { %v3089_v2 = vpop.f32.mrb[28].mxu0  ;;  %v4195_v3 = vpop.f32.mrb[37].mxu1  ;;  %3331 = vrot.lane.b32.xlu0 %v2937_v58, %s4439_s18 }
 0xee6   :  { %v4200_v4 = vpop.f32.mrb[29].mxu0 }
 0xee8   :  { %v3165_v6 = vpop.f32.mrb[38].mxu1 }
 0xee9   :  { %v3241_v8 = vpop.f32.mrb[30].mxu0  ;;  %3325 = vrot.lane.b32.xlu1 %v3165_v6, %s4438_s13  ;;  %v4205_v9 = vpop.f32.mrb[39].mxu1  ;;  %3339 = vrot.lane.b32.xlu0 %v3013_v1, %s4440_s19 }
 0xeea   :  { %v4210_v11 = vpop.f32.mrb[31].mxu0 }
 0xeec   :  { %v3317_v12 = vpop.f32.mrb[40].mxu1 }
 0xeed   :  { %3333 = vrot.lane.b32.xlu1 %v3241_v8, %s4439_s18  ;;  %v4215_v13 = vpop.f32.mrb[41].mxu1 }
 0xeee   :  { %v3865_v13 = vld [vmem:[%s5214_s4 + $0x78] sm:$0xff] }
 0xef1   :  { %3341 = vrot.lane.b32.xlu1 %v3317_v12, %s4440_s19  ;;  %v3864_v12 = vld [vmem:[%s5214_s4 + $0x70] sm:$0xff] }
 0xf53   :  { %v3324_v44 = vpop.permute.xlu0 %3323 }
 0xf54   :  { %v3345_v14 = vsel %vm145_vm2, %v2785_v54, %v3324_v44  ;;  %v4325_v54 = vpack.c.bf16 %v3861_v53, %v3860_v51  ;;  %v4333_v44 = vpack.c.bf16 %v3865_v13, %v3864_v12  ;;  %v3871_v12 = vld [vmem:[%s5215_s6] ss:$0 sm:$0xff] }
 0xf57   :  { %v3332_v48 = vpop.permute.xlu0 %3331 }
 0xf58   :  { %v3347_v15 = vsel %vm1508_vm3, %v3345_v14, %v3332_v48  ;;  %v3855_v48 = vld [vmem:[%s5209_s5 + $0xa] ss:$0 sm:$0xff] }
 0xf5b   :  { %v3340_v16 = vpop.permute.xlu0 %3339  ;;  %v3326_v7 = vpop.permute.xlu1 %3325 }
 0xf5c   :  { %v3349_v5 = vsel %vm1511_vm4, %v3347_v15, %v3340_v16  ;;  %v3346_v20 = vsel %vm145_vm2, %v3089_v2, %v3326_v7  ;;  %v3850_v2 = vld [vmem:[%s5209_s5 + $0xd] ss:$0 sm:$0xff] }
 0xf5d   :  { %4224 = vmatprep.mubr.msk.f32.mxu0 %vm47_vm0, %v3349_v5 }
 0xf5f   :  { %v3334_v17 = vpop.permute.xlu1 %3333 }
 0xf60   :  { %v3348_v21 = vsel %vm1508_vm3, %v3346_v20, %v3334_v17  ;;  %v3866_v20 = vld [vmem:[%s5209_s5 + $0xb] ss:$0 sm:$0xff] }
 0xf63   :  { %v3342_v22 = vpop.permute.xlu1 %3341 }
 0xf64   :  { %v3350_v23 = vsel %vm1511_vm4, %v3348_v21, %v3342_v22 }
 0xf65   :  { %4225 = vmatmul.mubr.msk.f32.vlgmr.msra.gmra.mrb[32].mxu0 %vm47_vm0, %v3350_v23 }
 0xf66   :  { %4324 = vmatpush3.bf16.msra.mxu0 %v4321_v52 }
 0xf67   :  { %4326 = vmatprep.subr.bf16.mxu0 %v4325_v54 }
 0xf6a   :  { %4328 = vmatpush3.bf16.msra.mxu0 %v4325_v54 }
 0xf6b   :  { %4330 = vmatprep.subr.bf16.mxu0 %v4329_v56 }
 0xf6e   :  { %4332 = vmatpush3.bf16.msra.mxu0 %v4329_v56 }
 0xf6f   :  { %4334 = vmatprep.subr.bf16.mxu0 %v4333_v44 }
 0xf72   :  { %4336 = vmatpush3.bf16.msra.mxu0 %v4333_v44 }
0x1038   :  { %v4226_v25 = vpop.f32.mrb[32].mxu0 }
0x1039   :  { %v3438_v26 = vadd.f32 %v4226_v25, %v3846_v24  ;;  %v3432_v27 = vpop.f32.mrb[33].mxu0 }
0x103a   :  { %v3433_v28 = vadd.f32 %v3846_v24, %v3432_v27 }
0x103b   :  { %v3442_v29 = vadd.f32 %v3438_v26, %v4863_v36 }
0x103c   :  { %v3441_v30 = vadd.f32 %v3433_v28, %v4861_v35  ;;  %v3851_v35 = vld [vmem:[%s5213_s3 + $0x20] sm:$0xff] }
0x103d   :  { %v3446_v31 = vsel %vm47_vm0, %v3442_v29, 0.0  ;;  %v4313_v46 = vpack.c.bf16 %v3852_v45, %v3851_v35 }
0x103e   :  { %3447 = vadd.xlane.f32.xlu1 %v3446_v31  ;;  %v3443_v32 = vsel %vm47_vm0, %v3441_v30, 0.0 }
0x103f   :  { %3444 = vadd.xlane.f32.xlu0 %v3443_v32  ;;  %4314 = vmatprep.subr.bf16.mxu1 %v4313_v46 }
0x1040   :  { %4316 = vmatpush3.bf16.msra.mxu1 %v4313_v46 }
0x1041   :  { %4318 = vmatprep.subr.bf16.mxu1 %v4317_v19 }
0x1044   :  { %4320 = vmatpush3.bf16.msra.mxu1 %v4317_v19 }
0x10cb   :  { %v3448_v33 = vpop.xlane.xlu1 %3447 }
0x10cc   :  { %v3450_v34 = vmul.f32 0.03125, %v3448_v33  ;;  %v3445_v37 = vpop.xlane.xlu0 %3444 }
0x10cd   :  { %v3449_v38 = vmul.f32 0.03125, %v3445_v37 }
0x10ce   :  { %v3452_v39 = vsub.f32 %v3442_v29, %v3450_v34 }
0x10cf   :  { %v3451_v40 = vsub.f32 %v3441_v30, %v3449_v38 }
0x10d0   :  { %v3454_v43 = vmul.f32 %v3452_v39, %v3452_v39 }
0x10d1   :  { %v3453_v41 = vmul.f32 %v3451_v40, %v3451_v40 }
0x10d2   :  { %v3458_v36 = vsel %vm47_vm0, %v3454_v43, 0.0 }
0x10d3   :  { %v3455_v42 = vsel %vm47_vm0, %v3453_v41, 0.0 }
0x10d4   :  { %3456 = vadd.xlane.f32.xlu0 %v3455_v42 }
0x10d8   :  { %3459 = vadd.xlane.f32.xlu0 %v3458_v36 }
0x1161   :  { %v3457_v57 = vpop.xlane.xlu0 %3456 }
0x1162   :  { %v3461_v58 = vmul.f32 0.03125, %v3457_v57 }
0x1164   :  { %v3463_v59 = vadd.f32 1e-05, %v3461_v58 }
0x1165   :  { %v3460_v60 = vpop.xlane.xlu0 %3459 }
0x1166   :  { %4419 = vrsqrt.f32 %v3463_v59  ;;  %v3462_v61 = vmul.f32 0.03125, %v3460_v60 }
0x1168   :  { %v3464_v62 = vadd.f32 1e-05, %v3462_v61 }
0x116a   :  { %4421 = vrsqrt.f32 %v3464_v62 }
0x1170   :  { %v4420_v63 = vpop.eup %4419 }
0x1171   :  { %v3467_v1 = vmul.f32 %v4420_v63, %v3451_v40 }
0x1173   :  { %v3473_v3 = vmul.f32 %v3849_v0, %v3467_v1 }
0x1174   :  { %v4422_v4 = vpop.eup %4421 }
0x1175   :  { %v3468_v6 = vmul.f32 %v4422_v4, %v3452_v39  ;;  %v3479_v8 = vadd.f32 %v3850_v2, %v3473_v3 }
0x1177   :  { %v3474_v9 = vmul.f32 %v3849_v0, %v3468_v6  ;;  %4235 = vmatprep.mubr.msk.f32.mxu1 %vm47_vm0, %v3479_v8 }
0x1179   :  { %v3480_v11 = vadd.f32 %v3850_v2, %v3474_v9 }
0x117b   :  { %4236 = vmatmul.mubr.msk.f32.vlgmr.msra.gmra.mrb[42].mxu1 %vm47_vm0, %v3480_v11 }
0x124e   :  { %v4237_v14 = vpop.f32.mrb[42].mxu1 }
0x124f   :  { %v3568_v15 = vadd.f32 %v4237_v14, %v3855_v48  ;;  %v3562_v16 = vpop.f32.mrb[43].mxu1 }
0x1250   :  { %v3563_v7 = vadd.f32 %v3855_v48, %v3562_v16  ;;  %v3872_v48 = vld [vmem:[%s5215_s6 + $0x1] ss:$0 sm:$0xff] }
0x1251   :  { %v3572_v17 = vmax.f32 %v3568_v15, 0.0 }
0x1252   :  { %v3571_v5 = vmax.f32 %v3563_v7, 0.0 }
0x1254   :  { %4254 = vmatprep.mubr.msk.f32.mxu0 %vm1747_vm5, %v3571_v5 }
0x1255   :  { %4255 = vmatmul.mubr.msk.f32.vlgmr.msra.gmra.mrb[34].mxu0 %vm1747_vm5, %v3572_v17 }
0x1328   :  { %v4256_v21 = vpop.f32.mrb[34].mxu0 }
0x1329   :  { %v3664_v22 = vadd.f32 %v4256_v21, %v3866_v20  ;;  %v3658_v23 = vpop.f32.mrb[35].mxu0 }
0x132a   :  { %v3659_v24 = vadd.f32 %v3866_v20, %v3658_v23 }
0x132b   :  { %v3668_v25 = vadd.f32 %v3664_v22, %v3480_v11 }
0x132c   :  { %v3667_v26 = vadd.f32 %v3659_v24, %v3479_v8 }
0x132d   :  { %v3672_v27 = vsel %vm47_vm0, %v3668_v25, 0.0 }
0x132e   :  { %3673 = vadd.xlane.f32.xlu0 %v3672_v27  ;;  %v3669_v28 = vsel %vm47_vm0, %v3667_v26, 0.0 }
0x132f   :  { %3670 = vadd.xlane.f32.xlu1 %v3669_v28 }
0x13bb   :  { %v3674_v29 = vpop.xlane.xlu0 %3673 }
0x13bc   :  { %v3676_v30 = vmul.f32 0.03125, %v3674_v29  ;;  %v3671_v31 = vpop.xlane.xlu1 %3670 }
0x13bd   :  { %v3675_v32 = vmul.f32 0.03125, %v3671_v31 }
0x13be   :  { %v3678_v33 = vsub.f32 %v3668_v25, %v3676_v30 }
0x13bf   :  { %v3677_v34 = vsub.f32 %v3667_v26, %v3675_v32 }
0x13c0   :  { %v3680_v37 = vmul.f32 %v3678_v33, %v3678_v33 }
0x13c1   :  { %v3679_v38 = vmul.f32 %v3677_v34, %v3677_v34 }
0x13c2   :  { %v3684_v39 = vsel %vm47_vm0, %v3680_v37, 0.0 }
0x13c3   :  { %3685 = vadd.xlane.f32.xlu0 %v3684_v39  ;;  %v3681_v40 = vsel %vm47_vm0, %v3679_v38, 0.0 }
0x13c4   :  { %3682 = vadd.xlane.f32.xlu1 %v3681_v40 }
0x1450   :  { %v3686_v41 = vpop.xlane.xlu0 %3685 }
0x1451   :  { %v3688_v42 = vmul.f32 0.03125, %v3686_v41  ;;  %v3683_v43 = vpop.xlane.xlu1 %3682 }
0x1452   :  { %v3687_v36 = vmul.f32 0.03125, %v3683_v43 }
0x1453   :  { %v3690_v35 = vadd.f32 1e-05, %v3688_v42 }
0x1454   :  { %v3689_v45 = vadd.f32 1e-05, %v3687_v36 }
0x1455   :  { %4423 = vrsqrt.f32 %v3690_v35 }
0x1456   :  { %4425 = vrsqrt.f32 %v3689_v45 }
0x145f   :  { %v4424_v46 = vpop.eup %4423 }
0x1460   :  { %v4426_v18 = vpop.eup %4425  ;;  %v3694_v19 = vmul.f32 %v4424_v46, %v3678_v33 }
0x1461   :  { %v3693_v50 = vmul.f32 %v4426_v18, %v3677_v34 }
0x1462   :  { %v3700_v51 = vmul.f32 %v3869_v47, %v3694_v19 }
0x1463   :  { %v3699_v52 = vmul.f32 %v3869_v47, %v3693_v50 }
0x1464   :  { %v3706_v53 = vadd.f32 %v3870_v49, %v3700_v51 }
0x1465   :  { %v3705_v54 = vadd.f32 %v3870_v49, %v3699_v52 }
0x1466   :  { %v3712_v55 = vsel %vm47_vm0, %v3706_v53, 0.0 }
0x1467   :  { %3713 = vadd.xlane.f32.xlu0 %v3712_v55  ;;  %v3709_v10 = vsel %vm47_vm0, %v3705_v54, 0.0 }
0x1468   :  { %3710 = vadd.xlane.f32.xlu1 %v3709_v10 }
0x14f4   :  { %v3714_v56 = vpop.xlane.xlu0 %3713 }
0x14f5   :  { %v3716_v57 = vmul.f32 0.03125, %v3714_v56  ;;  %v3711_v58 = vpop.xlane.xlu1 %3710 }
0x14f6   :  { %v3715_v59 = vmul.f32 0.03125, %v3711_v58 }
0x14f7   :  { %v3718_v60 = vsub.f32 %v3706_v53, %v3716_v57 }
0x14f8   :  { %v3717_v61 = vsub.f32 %v3705_v54, %v3715_v59 }
0x14f9   :  { %v3720_v62 = vmul.f32 %v3718_v60, %v3718_v60 }
0x14fa   :  { %v3719_v63 = vmul.f32 %v3717_v61, %v3717_v61 }
0x14fb   :  { %v3724_v0 = vsel %vm47_vm0, %v3720_v62, 0.0 }
0x14fc   :  { %3725 = vadd.xlane.f32.xlu0 %v3724_v0  ;;  %v3721_v1 = vsel %vm47_vm0, %v3719_v63, 0.0 }
0x14fd   :  { %3722 = vadd.xlane.f32.xlu1 %v3721_v1 }
0x1589   :  { %v3726_v2 = vpop.xlane.xlu0 %3725 }
0x158a   :  { %v3728_v3 = vmul.f32 0.03125, %v3726_v2  ;;  %v3723_v4 = vpop.xlane.xlu1 %3722 }
0x158b   :  { %v3727_v6 = vmul.f32 0.03125, %v3723_v4 }
0x158c   :  { %v3730_v8 = vadd.f32 1e-05, %v3728_v3 }
0x158d   :  { %v3729_v9 = vadd.f32 1e-05, %v3727_v6 }
0x158e   :  { %4427 = vrsqrt.f32 %v3730_v8 }
0x158f   :  { %4429 = vrsqrt.f32 %v3729_v9 }
0x1598   :  { %v4428_v11 = vpop.eup %4427 }
0x1599   :  { %v4430_v13 = vpop.eup %4429  ;;  %v3734_v44 = vmul.f32 %v4428_v11, %v3718_v60 }
0x159a   :  { %v3733_v14 = vmul.f32 %v4430_v13, %v3717_v61 }
0x159b   :  { %v3740_v15 = vmul.f32 %v3871_v12, %v3734_v44 }
0x159c   :  { %v3739_v16 = vmul.f32 %v3871_v12, %v3733_v14 }
0x159d   :  { %v3746_v7 = vadd.f32 %v3872_v48, %v3740_v15 }
0x159e   :  { %v3745_v5 = vadd.f32 %v3872_v48, %v3739_v16 }
0x159f   :  { %3748 = vst.msk [vmem:[%s5216_s7 + $0x8] sm:$0xff] %vm47_vm0, %v3746_v7 }
0x15a0   :  { %3747 = vst.msk [vmem:[%s5216_s7] sm:$0xff] %vm47_vm0, %v3745_v5 }

</bundles_post_ra>
